<compile_context>
chip_gen: v5e
topology: v5e:2x2
jax: 0.10.0
libtpu: 0.0.40
codegen_flags: <defaults>
</compile_context>

<pallas_src>
import jax
import jax.numpy as jnp
from jax.experimental import pallas as pl
from jax.experimental.pallas import tpu as pltpu

_LANE = 128
_SUBLANE = 8
_NPRED = 5
_STATS_PER_PRED = 5                  # pg, pp, l1, bce (un-negated), p_sum
_GG = _NPRED * _STATS_PER_PRED       # 25: sum(g*g)   (shared across preds)
_GSUM = _GG + 1                      # 26: sum(g)
_NSTATS = _GSUM + 1                  # 27

_VMEM_BUDGET = 16 << 20              # self-imposed budget (inputs + temporaries)
_VMEM_LIMIT = 32 << 20               # explicit scoped-VMEM limit (safe on all chips)
_MAX_TILE_R = 256                    # cap per review (v7x temporaries)


def _cdiv(a, b):
    return -(-a // b)


def _num_tensorcores():
    """2 on v7x (2 TensorCores per device), 1 on v5e/v6e — only split where it helps."""
    try:
        kind = jax.devices()[0].device_kind.lower()
    except Exception:
        return 1
    return 2 if "7" in kind else 1


def _choose_tile_r(rows, batch, in_bytes):
    # Budget: 2 buffers x 6 input streams (native dtype) + ~8 tile-sized f32
    # elementwise temporaries, all of shape (batch, tile_r, 128).
    per_row_bytes = batch * _LANE * (2 * 6 * in_bytes + 8 * 4)
    cap = (_VMEM_BUDGET // per_row_bytes) // _SUBLANE * _SUBLANE
    cap = max(_SUBLANE, min(_MAX_TILE_R, cap))
    if rows <= cap:
        return rows          # single full-extent block (no 8-divisibility needed)
    return cap


def _prep(x, batch, rows):
    """(B, ...) -> (B, rows, 128) view in the NATIVE dtype.

    Only pads up to one lane-row (<=127 elems/sample) when N % 128 != 0; the
    zero pad contributes exactly 0 to every statistic (see BCE clamp note).
    """
    x = x.reshape(batch, -1)
    pad = rows * _LANE - x.shape[1]
    if pad:
        x = jnp.pad(x, ((0, 0), (0, pad)))
    return x.reshape(batch, rows, _LANE)


def _make_stats_kernel(tile_r, rows, nblocks, total_blocks):
    """Build the accumulation kernel for a fixed static tiling."""
    has_tail = (rows % tile_r) != 0
    has_dups = total_blocks > nblocks            # clamped duplicate iterations exist
    valid_tail = rows - (nblocks - 1) * tile_r   # valid rows in the last block

    def kernel(gt_ref, p0_ref, p1_ref, p2_ref, p3_ref, p4_ref, out_ref):
        pred_refs = (p0_ref, p1_ref, p2_ref, p3_ref, p4_ref)

        @pl.when(pl.program_id(1) == 0)
        def _init():
            out_ref[...] = jnp.zeros_like(out_ref)

        def accumulate(row_mask):
            # Upcast to f32 at the load (inputs may be bf16/f16 in HBM).
            g = gt_ref[...].astype(jnp.float32)
            if row_mask is not None:
                # jnp.where (not multiply): OOB garbage may be NaN/Inf.
                g = jnp.where(row_mask, g, 0.0)
            one_minus_g = 1.0 - g                # hoisted, shared by all 5 preds

            def acc(j, term):
                # Reduce only the sublane (row) axis; keep 128 lane-partials.
                out_ref[0, j] += jnp.sum(term, axis=1)

            acc(_GG, g * g)
            acc(_GSUM, g)

            for i, p_ref in enumerate(pred_refs):
                p = p_ref[...].astype(jnp.float32)
                if row_mask is not None:
                    p = jnp.where(row_mask, p, 0.0)
                base = i * _STATS_PER_PRED
                # nn.BCELoss clamps each log term at -100.  Accumulate the
                # UN-negated partial; the minus sign is applied in the wrapper.
                log_p = jnp.maximum(jnp.log(p), -100.0)
                log_1mp = jnp.maximum(jnp.log(1.0 - p), -100.0)
                acc(base + 0, p * g)
                acc(base + 1, p * p)
                acc(base + 2, jnp.abs(p - g))
                acc(base + 3, g * log_p + one_minus_g * log_1mp)
                acc(base + 4, p)

        blk = pl.program_id(0) * pl.num_programs(1) + pl.program_id(1)

        if has_tail:
            if nblocks > 1:
                @pl.when(blk < nblocks - 1)
                def _full():
                    accumulate(None)

            @pl.when(blk == nblocks - 1)
            def _tail():
                row_idx = jax.lax.broadcasted_iota(
                    jnp.int32, (1, tile_r, _LANE), 1)
                accumulate(row_idx < valid_tail)
        elif has_dups:
            @pl.when(blk < nblocks)
            def _active():
                accumulate(None)
        else:
            accumulate(None)

    return kernel


def _compute_stats(gt, preds):
    """gt/preds: (B, rows, 128) in native dtype -> (27, B) f32 statistics."""
    batch, rows, _ = gt.shape
    in_bytes = jnp.dtype(gt.dtype).itemsize
    tile_r = _choose_tile_r(rows, batch, in_bytes)
    nblocks = _cdiv(rows, tile_r)
    nsplit = min(_num_tensorcores(), nblocks)
    ksteps = _cdiv(nblocks, nsplit)
    total_blocks = nsplit * ksteps

    def in_idx(s, k):
        b = s * ksteps + k
        if total_blocks > nblocks:
            # Clamp duplicate trailing iterations (they are skipped in-kernel).
            b = jnp.minimum(b, nblocks - 1)
        return (0, b, 0)

    in_spec = pl.BlockSpec((batch, tile_r, _LANE), in_idx)
    out_spec = pl.BlockSpec((1, _NSTATS, batch, _LANE), lambda s, k: (s, 0, 0, 0))

    elems = batch * rows * _LANE
    cost = pl.CostEstimate(
        flops=80 * elems,
        transcendentals=10 * elems,
        bytes_accessed=6 * elems * in_bytes + nsplit * _NSTATS * batch * _LANE * 4,
    )

    raw = pl.pallas_call(
        _make_stats_kernel(tile_r, rows, nblocks, total_blocks),
        out_shape=jax.ShapeDtypeStruct((nsplit, _NSTATS, batch, _LANE), jnp.float32),
        grid_spec=pltpu.PrefetchScalarGridSpec(
            num_scalar_prefetch=0,
            grid=(nsplit, ksteps),
            in_specs=[in_spec] * 6,
            out_specs=out_spec,
        ),
        compiler_params=pltpu.CompilerParams(
            dimension_semantics=("parallel", "arbitrary"),
            vmem_limit_bytes=_VMEM_LIMIT,
        ),
        cost_estimate=cost,
    )(gt, *preds)
    # Fold the split axis and the 128 lane-partials -> (NSTATS, B)
    return jnp.sum(raw, axis=(0, 3))


@jax.jit
def loss_doc_forward(ori, mid_out, gt, mid_outP2, mid_outP3, mid_outP4, mid_outP5):
    """Replicates Loss_Doc.forward. `ori` is unused (as in the PyTorch code)."""
    del ori
    batch = gt.shape[0]
    n = 1
    for d in gt.shape[1:]:
        n *= d
    total = float(batch * n)
    rows = _cdiv(n, _LANE)

    gt_t = _prep(gt, batch, rows)
    preds = [_prep(p, batch, rows)
             for p in (mid_out, mid_outP2, mid_outP3, mid_outP4, mid_outP5)]

    stats = _compute_stats(gt_t, preds)     # (27, B) f32

    gg = stats[_GG]                    # (B,)  sum(g*g) per sample
    g_total = jnp.sum(stats[_GSUM])    # scalar sum(g)

    l1_l, bce_l, dice_l, jac_l = [], [], [], []
    for i in range(_NPRED):
        base = i * _STATS_PER_PRED
        a = stats[base + 0]                       # (B,) sum(p*g)
        b = stats[base + 1] + 0.001               # sum(p*p) + eps
        c = gg + 0.001                            # sum(g*g) + eps
        d = 2.0 * a / (b + c + 0.0001)
        dice_l.append(1.0 - jnp.mean(d))
        l1_l.append(jnp.sum(stats[base + 2]) / total)
        bce_l.append(-jnp.sum(stats[base + 3]) / total)   # negate here, not per elem
        inter = jnp.sum(a)
        union = jnp.sum(stats[base + 4]) + g_total - inter
        jac_l.append(1.0 - (inter + 1e-6) / (union + 1e-6))

    # index 0: mid_out (fin); 1..4: P2..P5 weighted 1, 0.1, 0.01, 0.001
    w = (1.0, 0.1, 0.01, 0.001)
    mid_loss = sum(w[j] * (l1_l[j + 1] + bce_l[j + 1] + dice_l[j + 1] + jac_l[j + 1])
                   for j in range(4))

    return (l1_l[0], bce_l[0], dice_l[0], jac_l[0], mid_loss)


if __name__ == "__main__":
    def _ref_losses(p, g):
        B = p.shape[0]
        pf = p.reshape(B, -1).astype(jnp.float32)
        gf = g.reshape(B, -1).astype(jnp.float32)
        l1 = jnp.mean(jnp.abs(pf - gf))
        bce = jnp.mean(-(gf * jnp.maximum(jnp.log(pf), -100.0)
                         + (1 - gf) * jnp.maximum(jnp.log(1.0 - pf), -100.0)))
        a = jnp.sum(pf * gf, axis=1)
        b_ = jnp.sum(pf * pf, axis=1) + 0.001
        c_ = jnp.sum(gf * gf, axis=1) + 0.001
        dice = 1.0 - jnp.mean(2.0 * a / (b_ + c_ + 0.0001))
        inter = jnp.sum(pf * gf)
        union = jnp.sum(pf) + jnp.sum(gf) - inter
        jac = 1.0 - (inter + 1e-6) / (union + 1e-6)
        return l1, bce, dice, jac

    def _run_case(shape, case_idx):
        keys = jax.random.split(jax.random.fold_in(jax.random.PRNGKey(0), case_idx), 7)
        ori = jax.random.normal(keys[0], shape, jnp.float32)
        gt = jax.random.uniform(keys[1], shape, jnp.float32, minval=0.01, maxval=0.99)
        preds = [jax.nn.sigmoid(jax.random.normal(keys[i + 2], shape, jnp.float32))
                 for i in range(5)]
        out = loss_doc_forward(ori, preds[0], gt, preds[1], preds[2], preds[3], preds[4])
        out = jax.block_until_ready(out)

        refs = [_ref_losses(p, gt) for p in preds]
        w = (1.0, 0.1, 0.01, 0.001)
        ref_mid = sum(w[j] * sum(refs[j + 1]) for j in range(4))
        expected = list(refs[0]) + [ref_mid]
        for got, want in zip(out, expected):
            assert abs(float(got) - float(want)) < 1e-4, (shape, float(got), float(want))

    # Small lane-aligned case: N = 256 -> a single full-extent (B, 2, 128) block.
    _run_case((2, 1, 16, 16), 0)
    # Ragged case: N = 3*111*113 = 37629 -> tiny pad to 294 lane-rows, two
    # 256-row tiles with a 38-row tail -> exercises the in-kernel tail mask
    # and the multi-step reduction path.
    _run_case((2, 3, 111, 113), 1)

    print("KERNEL_OK")
</pallas_src>

<mosaic_0001>
module attributes {stable_mosaic.version = 11 : i64} {
  func.func @kernel(%arg0: i32, %arg1: i32, %arg2: memref<2x2x128xf32, #tpu.memory_space<vmem>>, %arg3: memref<2x2x128xf32, #tpu.memory_space<vmem>>, %arg4: memref<2x2x128xf32, #tpu.memory_space<vmem>>, %arg5: memref<2x2x128xf32, #tpu.memory_space<vmem>>, %arg6: memref<2x2x128xf32, #tpu.memory_space<vmem>>, %arg7: memref<2x2x128xf32, #tpu.memory_space<vmem>>, %arg8: memref<1x27x2x128xf32, #tpu.memory_space<vmem>>) attributes {dimension_semantics = [#tpu.dimension_semantics<parallel>, #tpu.dimension_semantics<arbitrary>], iteration_bounds = array<i64: 1, 1>, scalar_prefetch = 0 : i64, scratch_operands = 0 : i64, tpu.core_type = #tpu.core_type<tc>, window_params = [{transform_indices = @transform_0, window_bounds = array<i64: 2, 2, 128>}, {transform_indices = @transform_1, window_bounds = array<i64: 2, 2, 128>}, {transform_indices = @transform_2, window_bounds = array<i64: 2, 2, 128>}, {transform_indices = @transform_3, window_bounds = array<i64: 2, 2, 128>}, {transform_indices = @transform_4, window_bounds = array<i64: 2, 2, 128>}, {transform_indices = @transform_5, window_bounds = array<i64: 2, 2, 128>}, {transform_indices = @transform_6, window_bounds = array<i64: 1, 27, 2, 128>}]} {
    %c0_i32 = arith.constant 0 : i32
    %0 = arith.cmpi eq, %arg1, %c0_i32 : i32
    %1 = arith.extui %0 : i1 to i32
    %c0_i32_0 = arith.constant 0 : i32
    %2 = arith.cmpi ne, %1, %c0_i32_0 : i32
    scf.if %2 {
      %cst_250 = arith.constant 0.000000e+00 : f32
      %276 = vector.broadcast %cst_250 : f32 to vector<1x27x2x128xf32>
      %c0_251 = arith.constant 0 : index
      %c0_252 = arith.constant 0 : index
      %c0_253 = arith.constant 0 : index
      %c0_254 = arith.constant 0 : index
      %277 = vector.load %arg8[%c0_251, %c0_252, %c0_253, %c0_254] : memref<1x27x2x128xf32, #tpu.memory_space<vmem>>, vector<1x27x2x128xf32>
      tpu.vector_store %arg8[%c0_251, %c0_252, %c0_253, %c0_254], %276 {strides = array<i32>} : memref<1x27x2x128xf32, #tpu.memory_space<vmem>>, vector<1x27x2x128xf32>,
    } else {
    }
    %c0 = arith.constant 0 : index
    %c0_1 = arith.constant 0 : index
    %c0_2 = arith.constant 0 : index
    %3 = vector.load %arg2[%c0, %c0_1, %c0_2] : memref<2x2x128xf32, #tpu.memory_space<vmem>>, vector<2x2x128xf32>
    %cst = arith.constant 1.000000e+00 : f32
    %4 = vector.broadcast %cst : f32 to vector<2x2x128xf32>
    %5 = arith.subf %4, %3 : vector<2x2x128xf32>
    %6 = arith.mulf %3, %3 : vector<2x2x128xf32>
    %c0_3 = arith.constant 0 : index
    %c25 = arith.constant 25 : index
    %c0_4 = arith.constant 0 : index
    %c0_5 = arith.constant 0 : index
    %7 = vector.load %arg8[%c0_3, %c25, %c0_4, %c0_5] : memref<1x27x2x128xf32, #tpu.memory_space<vmem>>, vector<1x1x2x128xf32>
    %8 = vector.shape_cast %7 : vector<1x1x2x128xf32> to vector<2x128xf32>
    %cst_6 = arith.constant dense<0.000000e+00> : vector<2x128xf32>
    %9 = vector.multi_reduction <add>, %6, %cst_6 [1] : vector<2x2x128xf32> to vector<2x128xf32>
    %10 = arith.addf %8, %9 : vector<2x128xf32>
    %c0_7 = arith.constant 0 : index
    %c25_8 = arith.constant 25 : index
    %c0_9 = arith.constant 0 : index
    %c0_10 = arith.constant 0 : index
    %11 = vector.load %arg8[%c0_7, %c25_8, %c0_9, %c0_10] : memref<1x27x2x128xf32, #tpu.memory_space<vmem>>, vector<1x1x2x128xf32>
    %12 = vector.shape_cast %11 : vector<1x1x2x128xf32> to vector<2x128xf32>
    %13 = vector.shape_cast %10 : vector<2x128xf32> to vector<1x1x2x128xf32>
    tpu.vector_store %arg8[%c0_7, %c25_8, %c0_9, %c0_10], %13 {strides = array<i32>} : memref<1x27x2x128xf32, #tpu.memory_space<vmem>>, vector<1x1x2x128xf32>,
    %c0_11 = arith.constant 0 : index
    %c26 = arith.constant 26 : index
    %c0_12 = arith.constant 0 : index
    %c0_13 = arith.constant 0 : index
    %14 = vector.load %arg8[%c0_11, %c26, %c0_12, %c0_13] : memref<1x27x2x128xf32, #tpu.memory_space<vmem>>, vector<1x1x2x128xf32>
    %15 = vector.shape_cast %14 : vector<1x1x2x128xf32> to vector<2x128xf32>
    %cst_14 = arith.constant dense<0.000000e+00> : vector<2x128xf32>
    %16 = vector.multi_reduction <add>, %3, %cst_14 [1] : vector<2x2x128xf32> to vector<2x128xf32>
    %17 = arith.addf %15, %16 : vector<2x128xf32>
    %c0_15 = arith.constant 0 : index
    %c26_16 = arith.constant 26 : index
    %c0_17 = arith.constant 0 : index
    %c0_18 = arith.constant 0 : index
    %18 = vector.load %arg8[%c0_15, %c26_16, %c0_17, %c0_18] : memref<1x27x2x128xf32, #tpu.memory_space<vmem>>, vector<1x1x2x128xf32>
    %19 = vector.shape_cast %18 : vector<1x1x2x128xf32> to vector<2x128xf32>
    %20 = vector.shape_cast %17 : vector<2x128xf32> to vector<1x1x2x128xf32>
    tpu.vector_store %arg8[%c0_15, %c26_16, %c0_17, %c0_18], %20 {strides = array<i32>} : memref<1x27x2x128xf32, #tpu.memory_space<vmem>>, vector<1x1x2x128xf32>,
    %c0_19 = arith.constant 0 : index
    %c0_20 = arith.constant 0 : index
    %c0_21 = arith.constant 0 : index
    %21 = vector.load %arg3[%c0_19, %c0_20, %c0_21] : memref<2x2x128xf32, #tpu.memory_space<vmem>>, vector<2x2x128xf32>
    %22 = math.log %21 : vector<2x2x128xf32>
    %cst_22 = arith.constant -1.000000e+02 : f32
    %23 = vector.broadcast %cst_22 : f32 to vector<2x2x128xf32>
    %24 = arith.maximumf %22, %23 : vector<2x2x128xf32>
    %cst_23 = arith.constant 1.000000e+00 : f32
    %25 = vector.broadcast %cst_23 : f32 to vector<2x2x128xf32>
    %26 = arith.subf %25, %21 : vector<2x2x128xf32>
    %27 = math.log %26 : vector<2x2x128xf32>
    %cst_24 = arith.constant -1.000000e+02 : f32
    %28 = vector.broadcast %cst_24 : f32 to vector<2x2x128xf32>
    %29 = arith.maximumf %27, %28 : vector<2x2x128xf32>
    %30 = arith.mulf %21, %3 : vector<2x2x128xf32>
    %c0_25 = arith.constant 0 : index
    %c0_26 = arith.constant 0 : index
    %c0_27 = arith.constant 0 : index
    %c0_28 = arith.constant 0 : index
    %31 = vector.load %arg8[%c0_25, %c0_26, %c0_27, %c0_28] : memref<1x27x2x128xf32, #tpu.memory_space<vmem>>, vector<1x1x2x128xf32>
    %32 = vector.shape_cast %31 : vector<1x1x2x128xf32> to vector<2x128xf32>
    %cst_29 = arith.constant dense<0.000000e+00> : vector<2x128xf32>
    %33 = vector.multi_reduction <add>, %30, %cst_29 [1] : vector<2x2x128xf32> to vector<2x128xf32>
    %34 = arith.addf %32, %33 : vector<2x128xf32>
    %c0_30 = arith.constant 0 : index
    %c0_31 = arith.constant 0 : index
    %c0_32 = arith.constant 0 : index
    %c0_33 = arith.constant 0 : index
    %35 = vector.load %arg8[%c0_30, %c0_31, %c0_32, %c0_33] : memref<1x27x2x128xf32, #tpu.memory_space<vmem>>, vector<1x1x2x128xf32>
    %36 = vector.shape_cast %35 : vector<1x1x2x128xf32> to vector<2x128xf32>
    %37 = vector.shape_cast %34 : vector<2x128xf32> to vector<1x1x2x128xf32>
    tpu.vector_store %arg8[%c0_30, %c0_31, %c0_32, %c0_33], %37 {strides = array<i32>} : memref<1x27x2x128xf32, #tpu.memory_space<vmem>>, vector<1x1x2x128xf32>,
    %38 = arith.mulf %21, %21 : vector<2x2x128xf32>
    %c0_34 = arith.constant 0 : index
    %c1 = arith.constant 1 : index
    %c0_35 = arith.constant 0 : index
    %c0_36 = arith.constant 0 : index
    %39 = vector.load %arg8[%c0_34, %c1, %c0_35, %c0_36] : memref<1x27x2x128xf32, #tpu.memory_space<vmem>>, vector<1x1x2x128xf32>
    %40 = vector.shape_cast %39 : vector<1x1x2x128xf32> to vector<2x128xf32>
    %cst_37 = arith.constant dense<0.000000e+00> : vector<2x128xf32>
    %41 = vector.multi_reduction <add>, %38, %cst_37 [1] : vector<2x2x128xf32> to vector<2x128xf32>
    %42 = arith.addf %40, %41 : vector<2x128xf32>
    %c0_38 = arith.constant 0 : index
    %c1_39 = arith.constant 1 : index
    %c0_40 = arith.constant 0 : index
    %c0_41 = arith.constant 0 : index
    %43 = vector.load %arg8[%c0_38, %c1_39, %c0_40, %c0_41] : memref<1x27x2x128xf32, #tpu.memory_space<vmem>>, vector<1x1x2x128xf32>
    %44 = vector.shape_cast %43 : vector<1x1x2x128xf32> to vector<2x128xf32>
    %45 = vector.shape_cast %42 : vector<2x128xf32> to vector<1x1x2x128xf32>
    tpu.vector_store %arg8[%c0_38, %c1_39, %c0_40, %c0_41], %45 {strides = array<i32>} : memref<1x27x2x128xf32, #tpu.memory_space<vmem>>, vector<1x1x2x128xf32>,
    %46 = arith.subf %21, %3 : vector<2x2x128xf32>
    %47 = math.absf %46 : vector<2x2x128xf32>
    %c0_42 = arith.constant 0 : index
    %c2 = arith.constant 2 : index
    %c0_43 = arith.constant 0 : index
    %c0_44 = arith.constant 0 : index
    %48 = vector.load %arg8[%c0_42, %c2, %c0_43, %c0_44] : memref<1x27x2x128xf32, #tpu.memory_space<vmem>>, vector<1x1x2x128xf32>
    %49 = vector.shape_cast %48 : vector<1x1x2x128xf32> to vector<2x128xf32>
    %cst_45 = arith.constant dense<0.000000e+00> : vector<2x128xf32>
    %50 = vector.multi_reduction <add>, %47, %cst_45 [1] : vector<2x2x128xf32> to vector<2x128xf32>
    %51 = arith.addf %49, %50 : vector<2x128xf32>
    %c0_46 = arith.constant 0 : index
    %c2_47 = arith.constant 2 : index
    %c0_48 = arith.constant 0 : index
    %c0_49 = arith.constant 0 : index
    %52 = vector.load %arg8[%c0_46, %c2_47, %c0_48, %c0_49] : memref<1x27x2x128xf32, #tpu.memory_space<vmem>>, vector<1x1x2x128xf32>
    %53 = vector.shape_cast %52 : vector<1x1x2x128xf32> to vector<2x128xf32>
    %54 = vector.shape_cast %51 : vector<2x128xf32> to vector<1x1x2x128xf32>
    tpu.vector_store %arg8[%c0_46, %c2_47, %c0_48, %c0_49], %54 {strides = array<i32>} : memref<1x27x2x128xf32, #tpu.memory_space<vmem>>, vector<1x1x2x128xf32>,
    %55 = arith.mulf %3, %24 : vector<2x2x128xf32>
    %56 = arith.mulf %5, %29 : vector<2x2x128xf32>
    %57 = arith.addf %55, %56 : vector<2x2x128xf32>
    %c0_50 = arith.constant 0 : index
    %c3 = arith.constant 3 : index
    %c0_51 = arith.constant 0 : index
    %c0_52 = arith.constant 0 : index
    %58 = vector.load %arg8[%c0_50, %c3, %c0_51, %c0_52] : memref<1x27x2x128xf32, #tpu.memory_space<vmem>>, vector<1x1x2x128xf32>
    %59 = vector.shape_cast %58 : vector<1x1x2x128xf32> to vector<2x128xf32>
    %cst_53 = arith.constant dense<0.000000e+00> : vector<2x128xf32>
    %60 = vector.multi_reduction <add>, %57, %cst_53 [1] : vector<2x2x128xf32> to vector<2x128xf32>
    %61 = arith.addf %59, %60 : vector<2x128xf32>
    %c0_54 = arith.constant 0 : index
    %c3_55 = arith.constant 3 : index
    %c0_56 = arith.constant 0 : index
    %c0_57 = arith.constant 0 : index
    %62 = vector.load %arg8[%c0_54, %c3_55, %c0_56, %c0_57] : memref<1x27x2x128xf32, #tpu.memory_space<vmem>>, vector<1x1x2x128xf32>
    %63 = vector.shape_cast %62 : vector<1x1x2x128xf32> to vector<2x128xf32>
    %64 = vector.shape_cast %61 : vector<2x128xf32> to vector<1x1x2x128xf32>
    tpu.vector_store %arg8[%c0_54, %c3_55, %c0_56, %c0_57], %64 {strides = array<i32>} : memref<1x27x2x128xf32, #tpu.memory_space<vmem>>, vector<1x1x2x128xf32>,
    %c0_58 = arith.constant 0 : index
    %c4 = arith.constant 4 : index
    %c0_59 = arith.constant 0 : index
    %c0_60 = arith.constant 0 : index
    %65 = vector.load %arg8[%c0_58, %c4, %c0_59, %c0_60] : memref<1x27x2x128xf32, #tpu.memory_space<vmem>>, vector<1x1x2x128xf32>
    %66 = vector.shape_cast %65 : vector<1x1x2x128xf32> to vector<2x128xf32>
    %cst_61 = arith.constant dense<0.000000e+00> : vector<2x128xf32>
    %67 = vector.multi_reduction <add>, %21, %cst_61 [1] : vector<2x2x128xf32> to vector<2x128xf32>
    %68 = arith.addf %66, %67 : vector<2x128xf32>
    %c0_62 = arith.constant 0 : index
    %c4_63 = arith.constant 4 : index
    %c0_64 = arith.constant 0 : index
    %c0_65 = arith.constant 0 : index
    %69 = vector.load %arg8[%c0_62, %c4_63, %c0_64, %c0_65] : memref<1x27x2x128xf32, #tpu.memory_space<vmem>>, vector<1x1x2x128xf32>
    %70 = vector.shape_cast %69 : vector<1x1x2x128xf32> to vector<2x128xf32>
    %71 = vector.shape_cast %68 : vector<2x128xf32> to vector<1x1x2x128xf32>
    tpu.vector_store %arg8[%c0_62, %c4_63, %c0_64, %c0_65], %71 {strides = array<i32>} : memref<1x27x2x128xf32, #tpu.memory_space<vmem>>, vector<1x1x2x128xf32>,
    %c0_66 = arith.constant 0 : index
    %c0_67 = arith.constant 0 : index
    %c0_68 = arith.constant 0 : index
    %72 = vector.load %arg4[%c0_66, %c0_67, %c0_68] : memref<2x2x128xf32, #tpu.memory_space<vmem>>, vector<2x2x128xf32>
    %73 = math.log %72 : vector<2x2x128xf32>
    %cst_69 = arith.constant -1.000000e+02 : f32
    %74 = vector.broadcast %cst_69 : f32 to vector<2x2x128xf32>
    %75 = arith.maximumf %73, %74 : vector<2x2x128xf32>
    %cst_70 = arith.constant 1.000000e+00 : f32
    %76 = vector.broadcast %cst_70 : f32 to vector<2x2x128xf32>
    %77 = arith.subf %76, %72 : vector<2x2x128xf32>
    %78 = math.log %77 : vector<2x2x128xf32>
    %cst_71 = arith.constant -1.000000e+02 : f32
    %79 = vector.broadcast %cst_71 : f32 to vector<2x2x128xf32>
    %80 = arith.maximumf %78, %79 : vector<2x2x128xf32>
    %81 = arith.mulf %72, %3 : vector<2x2x128xf32>
    %c0_72 = arith.constant 0 : index
    %c5 = arith.constant 5 : index
    %c0_73 = arith.constant 0 : index
    %c0_74 = arith.constant 0 : index
    %82 = vector.load %arg8[%c0_72, %c5, %c0_73, %c0_74] : memref<1x27x2x128xf32, #tpu.memory_space<vmem>>, vector<1x1x2x128xf32>
    %83 = vector.shape_cast %82 : vector<1x1x2x128xf32> to vector<2x128xf32>
    %cst_75 = arith.constant dense<0.000000e+00> : vector<2x128xf32>
    %84 = vector.multi_reduction <add>, %81, %cst_75 [1] : vector<2x2x128xf32> to vector<2x128xf32>
    %85 = arith.addf %83, %84 : vector<2x128xf32>
    %c0_76 = arith.constant 0 : index
    %c5_77 = arith.constant 5 : index
    %c0_78 = arith.constant 0 : index
    %c0_79 = arith.constant 0 : index
    %86 = vector.load %arg8[%c0_76, %c5_77, %c0_78, %c0_79] : memref<1x27x2x128xf32, #tpu.memory_space<vmem>>, vector<1x1x2x128xf32>
    %87 = vector.shape_cast %86 : vector<1x1x2x128xf32> to vector<2x128xf32>
    %88 = vector.shape_cast %85 : vector<2x128xf32> to vector<1x1x2x128xf32>
    tpu.vector_store %arg8[%c0_76, %c5_77, %c0_78, %c0_79], %88 {strides = array<i32>} : memref<1x27x2x128xf32, #tpu.memory_space<vmem>>, vector<1x1x2x128xf32>,
    %89 = arith.mulf %72, %72 : vector<2x2x128xf32>
    %c0_80 = arith.constant 0 : index
    %c6 = arith.constant 6 : index
    %c0_81 = arith.constant 0 : index
    %c0_82 = arith.constant 0 : index
    %90 = vector.load %arg8[%c0_80, %c6, %c0_81, %c0_82] : memref<1x27x2x128xf32, #tpu.memory_space<vmem>>, vector<1x1x2x128xf32>
    %91 = vector.shape_cast %90 : vector<1x1x2x128xf32> to vector<2x128xf32>
    %cst_83 = arith.constant dense<0.000000e+00> : vector<2x128xf32>
    %92 = vector.multi_reduction <add>, %89, %cst_83 [1] : vector<2x2x128xf32> to vector<2x128xf32>
    %93 = arith.addf %91, %92 : vector<2x128xf32>
    %c0_84 = arith.constant 0 : index
    %c6_85 = arith.constant 6 : index
    %c0_86 = arith.constant 0 : index
    %c0_87 = arith.constant 0 : index
    %94 = vector.load %arg8[%c0_84, %c6_85, %c0_86, %c0_87] : memref<1x27x2x128xf32, #tpu.memory_space<vmem>>, vector<1x1x2x128xf32>
    %95 = vector.shape_cast %94 : vector<1x1x2x128xf32> to vector<2x128xf32>
    %96 = vector.shape_cast %93 : vector<2x128xf32> to vector<1x1x2x128xf32>
    tpu.vector_store %arg8[%c0_84, %c6_85, %c0_86, %c0_87], %96 {strides = array<i32>} : memref<1x27x2x128xf32, #tpu.memory_space<vmem>>, vector<1x1x2x128xf32>,
    %97 = arith.subf %72, %3 : vector<2x2x128xf32>
    %98 = math.absf %97 : vector<2x2x128xf32>
    %c0_88 = arith.constant 0 : index
    %c7 = arith.constant 7 : index
    %c0_89 = arith.constant 0 : index
    %c0_90 = arith.constant 0 : index
    %99 = vector.load %arg8[%c0_88, %c7, %c0_89, %c0_90] : memref<1x27x2x128xf32, #tpu.memory_space<vmem>>, vector<1x1x2x128xf32>
    %100 = vector.shape_cast %99 : vector<1x1x2x128xf32> to vector<2x128xf32>
    %cst_91 = arith.constant dense<0.000000e+00> : vector<2x128xf32>
    %101 = vector.multi_reduction <add>, %98, %cst_91 [1] : vector<2x2x128xf32> to vector<2x128xf32>
    %102 = arith.addf %100, %101 : vector<2x128xf32>
    %c0_92 = arith.constant 0 : index
    %c7_93 = arith.constant 7 : index
    %c0_94 = arith.constant 0 : index
    %c0_95 = arith.constant 0 : index
    %103 = vector.load %arg8[%c0_92, %c7_93, %c0_94, %c0_95] : memref<1x27x2x128xf32, #tpu.memory_space<vmem>>, vector<1x1x2x128xf32>
    %104 = vector.shape_cast %103 : vector<1x1x2x128xf32> to vector<2x128xf32>
    %105 = vector.shape_cast %102 : vector<2x128xf32> to vector<1x1x2x128xf32>
    tpu.vector_store %arg8[%c0_92, %c7_93, %c0_94, %c0_95], %105 {strides = array<i32>} : memref<1x27x2x128xf32, #tpu.memory_space<vmem>>, vector<1x1x2x128xf32>,
    %106 = arith.mulf %3, %75 : vector<2x2x128xf32>
    %107 = arith.mulf %5, %80 : vector<2x2x128xf32>
    %108 = arith.addf %106, %107 : vector<2x2x128xf32>
    %c0_96 = arith.constant 0 : index
    %c8 = arith.constant 8 : index
    %c0_97 = arith.constant 0 : index
    %c0_98 = arith.constant 0 : index
    %109 = vector.load %arg8[%c0_96, %c8, %c0_97, %c0_98] : memref<1x27x2x128xf32, #tpu.memory_space<vmem>>, vector<1x1x2x128xf32>
    %110 = vector.shape_cast %109 : vector<1x1x2x128xf32> to vector<2x128xf32>
    %cst_99 = arith.constant dense<0.000000e+00> : vector<2x128xf32>
    %111 = vector.multi_reduction <add>, %108, %cst_99 [1] : vector<2x2x128xf32> to vector<2x128xf32>
    %112 = arith.addf %110, %111 : vector<2x128xf32>
    %c0_100 = arith.constant 0 : index
    %c8_101 = arith.constant 8 : index
    %c0_102 = arith.constant 0 : index
    %c0_103 = arith.constant 0 : index
    %113 = vector.load %arg8[%c0_100, %c8_101, %c0_102, %c0_103] : memref<1x27x2x128xf32, #tpu.memory_space<vmem>>, vector<1x1x2x128xf32>
    %114 = vector.shape_cast %113 : vector<1x1x2x128xf32> to vector<2x128xf32>
    %115 = vector.shape_cast %112 : vector<2x128xf32> to vector<1x1x2x128xf32>
    tpu.vector_store %arg8[%c0_100, %c8_101, %c0_102, %c0_103], %115 {strides = array<i32>} : memref<1x27x2x128xf32, #tpu.memory_space<vmem>>, vector<1x1x2x128xf32>,
    %c0_104 = arith.constant 0 : index
    %c9 = arith.constant 9 : index
    %c0_105 = arith.constant 0 : index
    %c0_106 = arith.constant 0 : index
    %116 = vector.load %arg8[%c0_104, %c9, %c0_105, %c0_106] : memref<1x27x2x128xf32, #tpu.memory_space<vmem>>, vector<1x1x2x128xf32>
    %117 = vector.shape_cast %116 : vector<1x1x2x128xf32> to vector<2x128xf32>
    %cst_107 = arith.constant dense<0.000000e+00> : vector<2x128xf32>
    %118 = vector.multi_reduction <add>, %72, %cst_107 [1] : vector<2x2x128xf32> to vector<2x128xf32>
    %119 = arith.addf %117, %118 : vector<2x128xf32>
    %c0_108 = arith.constant 0 : index
    %c9_109 = arith.constant 9 : index
    %c0_110 = arith.constant 0 : index
    %c0_111 = arith.constant 0 : index
    %120 = vector.load %arg8[%c0_108, %c9_109, %c0_110, %c0_111] : memref<1x27x2x128xf32, #tpu.memory_space<vmem>>, vector<1x1x2x128xf32>
    %121 = vector.shape_cast %120 : vector<1x1x2x128xf32> to vector<2x128xf32>
    %122 = vector.shape_cast %119 : vector<2x128xf32> to vector<1x1x2x128xf32>
    tpu.vector_store %arg8[%c0_108, %c9_109, %c0_110, %c0_111], %122 {strides = array<i32>} : memref<1x27x2x128xf32, #tpu.memory_space<vmem>>, vector<1x1x2x128xf32>,
    %c0_112 = arith.constant 0 : index
    %c0_113 = arith.constant 0 : index
    %c0_114 = arith.constant 0 : index
    %123 = vector.load %arg5[%c0_112, %c0_113, %c0_114] : memref<2x2x128xf32, #tpu.memory_space<vmem>>, vector<2x2x128xf32>
    %124 = math.log %123 : vector<2x2x128xf32>
    %cst_115 = arith.constant -1.000000e+02 : f32
    %125 = vector.broadcast %cst_115 : f32 to vector<2x2x128xf32>
    %126 = arith.maximumf %124, %125 : vector<2x2x128xf32>
    %cst_116 = arith.constant 1.000000e+00 : f32
    %127 = vector.broadcast %cst_116 : f32 to vector<2x2x128xf32>
    %128 = arith.subf %127, %123 : vector<2x2x128xf32>
    %129 = math.log %128 : vector<2x2x128xf32>
    %cst_117 = arith.constant -1.000000e+02 : f32
    %130 = vector.broadcast %cst_117 : f32 to vector<2x2x128xf32>
    %131 = arith.maximumf %129, %130 : vector<2x2x128xf32>
    %132 = arith.mulf %123, %3 : vector<2x2x128xf32>
    %c0_118 = arith.constant 0 : index
    %c10 = arith.constant 10 : index
    %c0_119 = arith.constant 0 : index
    %c0_120 = arith.constant 0 : index
    %133 = vector.load %arg8[%c0_118, %c10, %c0_119, %c0_120] : memref<1x27x2x128xf32, #tpu.memory_space<vmem>>, vector<1x1x2x128xf32>
    %134 = vector.shape_cast %133 : vector<1x1x2x128xf32> to vector<2x128xf32>
    %cst_121 = arith.constant dense<0.000000e+00> : vector<2x128xf32>
    %135 = vector.multi_reduction <add>, %132, %cst_121 [1] : vector<2x2x128xf32> to vector<2x128xf32>
    %136 = arith.addf %134, %135 : vector<2x128xf32>
    %c0_122 = arith.constant 0 : index
    %c10_123 = arith.constant 10 : index
    %c0_124 = arith.constant 0 : index
    %c0_125 = arith.constant 0 : index
    %137 = vector.load %arg8[%c0_122, %c10_123, %c0_124, %c0_125] : memref<1x27x2x128xf32, #tpu.memory_space<vmem>>, vector<1x1x2x128xf32>
    %138 = vector.shape_cast %137 : vector<1x1x2x128xf32> to vector<2x128xf32>
    %139 = vector.shape_cast %136 : vector<2x128xf32> to vector<1x1x2x128xf32>
    tpu.vector_store %arg8[%c0_122, %c10_123, %c0_124, %c0_125], %139 {strides = array<i32>} : memref<1x27x2x128xf32, #tpu.memory_space<vmem>>, vector<1x1x2x128xf32>,
    %140 = arith.mulf %123, %123 : vector<2x2x128xf32>
    %c0_126 = arith.constant 0 : index
    %c11 = arith.constant 11 : index
    %c0_127 = arith.constant 0 : index
    %c0_128 = arith.constant 0 : index
    %141 = vector.load %arg8[%c0_126, %c11, %c0_127, %c0_128] : memref<1x27x2x128xf32, #tpu.memory_space<vmem>>, vector<1x1x2x128xf32>
    %142 = vector.shape_cast %141 : vector<1x1x2x128xf32> to vector<2x128xf32>
    %cst_129 = arith.constant dense<0.000000e+00> : vector<2x128xf32>
    %143 = vector.multi_reduction <add>, %140, %cst_129 [1] : vector<2x2x128xf32> to vector<2x128xf32>
    %144 = arith.addf %142, %143 : vector<2x128xf32>
    %c0_130 = arith.constant 0 : index
    %c11_131 = arith.constant 11 : index
    %c0_132 = arith.constant 0 : index
    %c0_133 = arith.constant 0 : index
    %145 = vector.load %arg8[%c0_130, %c11_131, %c0_132, %c0_133] : memref<1x27x2x128xf32, #tpu.memory_space<vmem>>, vector<1x1x2x128xf32>
    %146 = vector.shape_cast %145 : vector<1x1x2x128xf32> to vector<2x128xf32>
    %147 = vector.shape_cast %144 : vector<2x128xf32> to vector<1x1x2x128xf32>
    tpu.vector_store %arg8[%c0_130, %c11_131, %c0_132, %c0_133], %147 {strides = array<i32>} : memref<1x27x2x128xf32, #tpu.memory_space<vmem>>, vector<1x1x2x128xf32>,
    %148 = arith.subf %123, %3 : vector<2x2x128xf32>
    %149 = math.absf %148 : vector<2x2x128xf32>
    %c0_134 = arith.constant 0 : index
    %c12 = arith.constant 12 : index
    %c0_135 = arith.constant 0 : index
    %c0_136 = arith.constant 0 : index
    %150 = vector.load %arg8[%c0_134, %c12, %c0_135, %c0_136] : memref<1x27x2x128xf32, #tpu.memory_space<vmem>>, vector<1x1x2x128xf32>
    %151 = vector.shape_cast %150 : vector<1x1x2x128xf32> to vector<2x128xf32>
    %cst_137 = arith.constant dense<0.000000e+00> : vector<2x128xf32>
    %152 = vector.multi_reduction <add>, %149, %cst_137 [1] : vector<2x2x128xf32> to vector<2x128xf32>
    %153 = arith.addf %151, %152 : vector<2x128xf32>
    %c0_138 = arith.constant 0 : index
    %c12_139 = arith.constant 12 : index
    %c0_140 = arith.constant 0 : index
    %c0_141 = arith.constant 0 : index
    %154 = vector.load %arg8[%c0_138, %c12_139, %c0_140, %c0_141] : memref<1x27x2x128xf32, #tpu.memory_space<vmem>>, vector<1x1x2x128xf32>
    %155 = vector.shape_cast %154 : vector<1x1x2x128xf32> to vector<2x128xf32>
    %156 = vector.shape_cast %153 : vector<2x128xf32> to vector<1x1x2x128xf32>
    tpu.vector_store %arg8[%c0_138, %c12_139, %c0_140, %c0_141], %156 {strides = array<i32>} : memref<1x27x2x128xf32, #tpu.memory_space<vmem>>, vector<1x1x2x128xf32>,
    %157 = arith.mulf %3, %126 : vector<2x2x128xf32>
    %158 = arith.mulf %5, %131 : vector<2x2x128xf32>
    %159 = arith.addf %157, %158 : vector<2x2x128xf32>
    %c0_142 = arith.constant 0 : index
    %c13 = arith.constant 13 : index
    %c0_143 = arith.constant 0 : index
    %c0_144 = arith.constant 0 : index
    %160 = vector.load %arg8[%c0_142, %c13, %c0_143, %c0_144] : memref<1x27x2x128xf32, #tpu.memory_space<vmem>>, vector<1x1x2x128xf32>
    %161 = vector.shape_cast %160 : vector<1x1x2x128xf32> to vector<2x128xf32>
    %cst_145 = arith.constant dense<0.000000e+00> : vector<2x128xf32>
    %162 = vector.multi_reduction <add>, %159, %cst_145 [1] : vector<2x2x128xf32> to vector<2x128xf32>
    %163 = arith.addf %161, %162 : vector<2x128xf32>
    %c0_146 = arith.constant 0 : index
    %c13_147 = arith.constant 13 : index
    %c0_148 = arith.constant 0 : index
    %c0_149 = arith.constant 0 : index
    %164 = vector.load %arg8[%c0_146, %c13_147, %c0_148, %c0_149] : memref<1x27x2x128xf32, #tpu.memory_space<vmem>>, vector<1x1x2x128xf32>
    %165 = vector.shape_cast %164 : vector<1x1x2x128xf32> to vector<2x128xf32>
    %166 = vector.shape_cast %163 : vector<2x128xf32> to vector<1x1x2x128xf32>
    tpu.vector_store %arg8[%c0_146, %c13_147, %c0_148, %c0_149], %166 {strides = array<i32>} : memref<1x27x2x128xf32, #tpu.memory_space<vmem>>, vector<1x1x2x128xf32>,
    %c0_150 = arith.constant 0 : index
    %c14 = arith.constant 14 : index
    %c0_151 = arith.constant 0 : index
    %c0_152 = arith.constant 0 : index
    %167 = vector.load %arg8[%c0_150, %c14, %c0_151, %c0_152] : memref<1x27x2x128xf32, #tpu.memory_space<vmem>>, vector<1x1x2x128xf32>
    %168 = vector.shape_cast %167 : vector<1x1x2x128xf32> to vector<2x128xf32>
    %cst_153 = arith.constant dense<0.000000e+00> : vector<2x128xf32>
    %169 = vector.multi_reduction <add>, %123, %cst_153 [1] : vector<2x2x128xf32> to vector<2x128xf32>
    %170 = arith.addf %168, %169 : vector<2x128xf32>
    %c0_154 = arith.constant 0 : index
    %c14_155 = arith.constant 14 : index
    %c0_156 = arith.constant 0 : index
    %c0_157 = arith.constant 0 : index
    %171 = vector.load %arg8[%c0_154, %c14_155, %c0_156, %c0_157] : memref<1x27x2x128xf32, #tpu.memory_space<vmem>>, vector<1x1x2x128xf32>
    %172 = vector.shape_cast %171 : vector<1x1x2x128xf32> to vector<2x128xf32>
    %173 = vector.shape_cast %170 : vector<2x128xf32> to vector<1x1x2x128xf32>
    tpu.vector_store %arg8[%c0_154, %c14_155, %c0_156, %c0_157], %173 {strides = array<i32>} : memref<1x27x2x128xf32, #tpu.memory_space<vmem>>, vector<1x1x2x128xf32>,
    %c0_158 = arith.constant 0 : index
    %c0_159 = arith.constant 0 : index
    %c0_160 = arith.constant 0 : index
    %174 = vector.load %arg6[%c0_158, %c0_159, %c0_160] : memref<2x2x128xf32, #tpu.memory_space<vmem>>, vector<2x2x128xf32>
    %175 = math.log %174 : vector<2x2x128xf32>
    %cst_161 = arith.constant -1.000000e+02 : f32
    %176 = vector.broadcast %cst_161 : f32 to vector<2x2x128xf32>
    %177 = arith.maximumf %175, %176 : vector<2x2x128xf32>
    %cst_162 = arith.constant 1.000000e+00 : f32
    %178 = vector.broadcast %cst_162 : f32 to vector<2x2x128xf32>
    %179 = arith.subf %178, %174 : vector<2x2x128xf32>
    %180 = math.log %179 : vector<2x2x128xf32>
    %cst_163 = arith.constant -1.000000e+02 : f32
    %181 = vector.broadcast %cst_163 : f32 to vector<2x2x128xf32>
    %182 = arith.maximumf %180, %181 : vector<2x2x128xf32>
    %183 = arith.mulf %174, %3 : vector<2x2x128xf32>
    %c0_164 = arith.constant 0 : index
    %c15 = arith.constant 15 : index
    %c0_165 = arith.constant 0 : index
    %c0_166 = arith.constant 0 : index
    %184 = vector.load %arg8[%c0_164, %c15, %c0_165, %c0_166] : memref<1x27x2x128xf32, #tpu.memory_space<vmem>>, vector<1x1x2x128xf32>
    %185 = vector.shape_cast %184 : vector<1x1x2x128xf32> to vector<2x128xf32>
    %cst_167 = arith.constant dense<0.000000e+00> : vector<2x128xf32>
    %186 = vector.multi_reduction <add>, %183, %cst_167 [1] : vector<2x2x128xf32> to vector<2x128xf32>
    %187 = arith.addf %185, %186 : vector<2x128xf32>
    %c0_168 = arith.constant 0 : index
    %c15_169 = arith.constant 15 : index
    %c0_170 = arith.constant 0 : index
    %c0_171 = arith.constant 0 : index
    %188 = vector.load %arg8[%c0_168, %c15_169, %c0_170, %c0_171] : memref<1x27x2x128xf32, #tpu.memory_space<vmem>>, vector<1x1x2x128xf32>
    %189 = vector.shape_cast %188 : vector<1x1x2x128xf32> to vector<2x128xf32>
    %190 = vector.shape_cast %187 : vector<2x128xf32> to vector<1x1x2x128xf32>
    tpu.vector_store %arg8[%c0_168, %c15_169, %c0_170, %c0_171], %190 {strides = array<i32>} : memref<1x27x2x128xf32, #tpu.memory_space<vmem>>, vector<1x1x2x128xf32>,
    %191 = arith.mulf %174, %174 : vector<2x2x128xf32>
    %c0_172 = arith.constant 0 : index
    %c16 = arith.constant 16 : index
    %c0_173 = arith.constant 0 : index
    %c0_174 = arith.constant 0 : index
    %192 = vector.load %arg8[%c0_172, %c16, %c0_173, %c0_174] : memref<1x27x2x128xf32, #tpu.memory_space<vmem>>, vector<1x1x2x128xf32>
    %193 = vector.shape_cast %192 : vector<1x1x2x128xf32> to vector<2x128xf32>
    %cst_175 = arith.constant dense<0.000000e+00> : vector<2x128xf32>
    %194 = vector.multi_reduction <add>, %191, %cst_175 [1] : vector<2x2x128xf32> to vector<2x128xf32>
    %195 = arith.addf %193, %194 : vector<2x128xf32>
    %c0_176 = arith.constant 0 : index
    %c16_177 = arith.constant 16 : index
    %c0_178 = arith.constant 0 : index
    %c0_179 = arith.constant 0 : index
    %196 = vector.load %arg8[%c0_176, %c16_177, %c0_178, %c0_179] : memref<1x27x2x128xf32, #tpu.memory_space<vmem>>, vector<1x1x2x128xf32>
    %197 = vector.shape_cast %196 : vector<1x1x2x128xf32> to vector<2x128xf32>
    %198 = vector.shape_cast %195 : vector<2x128xf32> to vector<1x1x2x128xf32>
    tpu.vector_store %arg8[%c0_176, %c16_177, %c0_178, %c0_179], %198 {strides = array<i32>} : memref<1x27x2x128xf32, #tpu.memory_space<vmem>>, vector<1x1x2x128xf32>,
    %199 = arith.subf %174, %3 : vector<2x2x128xf32>
    %200 = math.absf %199 : vector<2x2x128xf32>
    %c0_180 = arith.constant 0 : index
    %c17 = arith.constant 17 : index
    %c0_181 = arith.constant 0 : index
    %c0_182 = arith.constant 0 : index
    %201 = vector.load %arg8[%c0_180, %c17, %c0_181, %c0_182] : memref<1x27x2x128xf32, #tpu.memory_space<vmem>>, vector<1x1x2x128xf32>
    %202 = vector.shape_cast %201 : vector<1x1x2x128xf32> to vector<2x128xf32>
    %cst_183 = arith.constant dense<0.000000e+00> : vector<2x128xf32>
    %203 = vector.multi_reduction <add>, %200, %cst_183 [1] : vector<2x2x128xf32> to vector<2x128xf32>
    %204 = arith.addf %202, %203 : vector<2x128xf32>
    %c0_184 = arith.constant 0 : index
    %c17_185 = arith.constant 17 : index
    %c0_186 = arith.constant 0 : index
    %c0_187 = arith.constant 0 : index
    %205 = vector.load %arg8[%c0_184, %c17_185, %c0_186, %c0_187] : memref<1x27x2x128xf32, #tpu.memory_space<vmem>>, vector<1x1x2x128xf32>
    %206 = vector.shape_cast %205 : vector<1x1x2x128xf32> to vector<2x128xf32>
    %207 = vector.shape_cast %204 : vector<2x128xf32> to vector<1x1x2x128xf32>
    tpu.vector_store %arg8[%c0_184, %c17_185, %c0_186, %c0_187], %207 {strides = array<i32>} : memref<1x27x2x128xf32, #tpu.memory_space<vmem>>, vector<1x1x2x128xf32>,
    %208 = arith.mulf %3, %177 : vector<2x2x128xf32>
    %209 = arith.mulf %5, %182 : vector<2x2x128xf32>
    %210 = arith.addf %208, %209 : vector<2x2x128xf32>
    %c0_188 = arith.constant 0 : index
    %c18 = arith.constant 18 : index
    %c0_189 = arith.constant 0 : index
    %c0_190 = arith.constant 0 : index
    %211 = vector.load %arg8[%c0_188, %c18, %c0_189, %c0_190] : memref<1x27x2x128xf32, #tpu.memory_space<vmem>>, vector<1x1x2x128xf32>
    %212 = vector.shape_cast %211 : vector<1x1x2x128xf32> to vector<2x128xf32>
    %cst_191 = arith.constant dense<0.000000e+00> : vector<2x128xf32>
    %213 = vector.multi_reduction <add>, %210, %cst_191 [1] : vector<2x2x128xf32> to vector<2x128xf32>
    %214 = arith.addf %212, %213 : vector<2x128xf32>
    %c0_192 = arith.constant 0 : index
    %c18_193 = arith.constant 18 : index
    %c0_194 = arith.constant 0 : index
    %c0_195 = arith.constant 0 : index
    %215 = vector.load %arg8[%c0_192, %c18_193, %c0_194, %c0_195] : memref<1x27x2x128xf32, #tpu.memory_space<vmem>>, vector<1x1x2x128xf32>
    %216 = vector.shape_cast %215 : vector<1x1x2x128xf32> to vector<2x128xf32>
    %217 = vector.shape_cast %214 : vector<2x128xf32> to vector<1x1x2x128xf32>
    tpu.vector_store %arg8[%c0_192, %c18_193, %c0_194, %c0_195], %217 {strides = array<i32>} : memref<1x27x2x128xf32, #tpu.memory_space<vmem>>, vector<1x1x2x128xf32>,
    %c0_196 = arith.constant 0 : index
    %c19 = arith.constant 19 : index
    %c0_197 = arith.constant 0 : index
    %c0_198 = arith.constant 0 : index
    %218 = vector.load %arg8[%c0_196, %c19, %c0_197, %c0_198] : memref<1x27x2x128xf32, #tpu.memory_space<vmem>>, vector<1x1x2x128xf32>
    %219 = vector.shape_cast %218 : vector<1x1x2x128xf32> to vector<2x128xf32>
    %cst_199 = arith.constant dense<0.000000e+00> : vector<2x128xf32>
    %220 = vector.multi_reduction <add>, %174, %cst_199 [1] : vector<2x2x128xf32> to vector<2x128xf32>
    %221 = arith.addf %219, %220 : vector<2x128xf32>
    %c0_200 = arith.constant 0 : index
    %c19_201 = arith.constant 19 : index
    %c0_202 = arith.constant 0 : index
    %c0_203 = arith.constant 0 : index
    %222 = vector.load %arg8[%c0_200, %c19_201, %c0_202, %c0_203] : memref<1x27x2x128xf32, #tpu.memory_space<vmem>>, vector<1x1x2x128xf32>
    %223 = vector.shape_cast %222 : vector<1x1x2x128xf32> to vector<2x128xf32>
    %224 = vector.shape_cast %221 : vector<2x128xf32> to vector<1x1x2x128xf32>
    tpu.vector_store %arg8[%c0_200, %c19_201, %c0_202, %c0_203], %224 {strides = array<i32>} : memref<1x27x2x128xf32, #tpu.memory_space<vmem>>, vector<1x1x2x128xf32>,
    %c0_204 = arith.constant 0 : index
    %c0_205 = arith.constant 0 : index
    %c0_206 = arith.constant 0 : index
    %225 = vector.load %arg7[%c0_204, %c0_205, %c0_206] : memref<2x2x128xf32, #tpu.memory_space<vmem>>, vector<2x2x128xf32>
    %226 = math.log %225 : vector<2x2x128xf32>
    %cst_207 = arith.constant -1.000000e+02 : f32
    %227 = vector.broadcast %cst_207 : f32 to vector<2x2x128xf32>
    %228 = arith.maximumf %226, %227 : vector<2x2x128xf32>
    %cst_208 = arith.constant 1.000000e+00 : f32
    %229 = vector.broadcast %cst_208 : f32 to vector<2x2x128xf32>
    %230 = arith.subf %229, %225 : vector<2x2x128xf32>
    %231 = math.log %230 : vector<2x2x128xf32>
    %cst_209 = arith.constant -1.000000e+02 : f32
    %232 = vector.broadcast %cst_209 : f32 to vector<2x2x128xf32>
    %233 = arith.maximumf %231, %232 : vector<2x2x128xf32>
    %234 = arith.mulf %225, %3 : vector<2x2x128xf32>
    %c0_210 = arith.constant 0 : index
    %c20 = arith.constant 20 : index
    %c0_211 = arith.constant 0 : index
    %c0_212 = arith.constant 0 : index
    %235 = vector.load %arg8[%c0_210, %c20, %c0_211, %c0_212] : memref<1x27x2x128xf32, #tpu.memory_space<vmem>>, vector<1x1x2x128xf32>
    %236 = vector.shape_cast %235 : vector<1x1x2x128xf32> to vector<2x128xf32>
    %cst_213 = arith.constant dense<0.000000e+00> : vector<2x128xf32>
    %237 = vector.multi_reduction <add>, %234, %cst_213 [1] : vector<2x2x128xf32> to vector<2x128xf32>
    %238 = arith.addf %236, %237 : vector<2x128xf32>
    %c0_214 = arith.constant 0 : index
    %c20_215 = arith.constant 20 : index
    %c0_216 = arith.constant 0 : index
    %c0_217 = arith.constant 0 : index
    %239 = vector.load %arg8[%c0_214, %c20_215, %c0_216, %c0_217] : memref<1x27x2x128xf32, #tpu.memory_space<vmem>>, vector<1x1x2x128xf32>
    %240 = vector.shape_cast %239 : vector<1x1x2x128xf32> to vector<2x128xf32>
    %241 = vector.shape_cast %238 : vector<2x128xf32> to vector<1x1x2x128xf32>
    tpu.vector_store %arg8[%c0_214, %c20_215, %c0_216, %c0_217], %241 {strides = array<i32>} : memref<1x27x2x128xf32, #tpu.memory_space<vmem>>, vector<1x1x2x128xf32>,
    %242 = arith.mulf %225, %225 : vector<2x2x128xf32>
    %c0_218 = arith.constant 0 : index
    %c21 = arith.constant 21 : index
    %c0_219 = arith.constant 0 : index
    %c0_220 = arith.constant 0 : index
    %243 = vector.load %arg8[%c0_218, %c21, %c0_219, %c0_220] : memref<1x27x2x128xf32, #tpu.memory_space<vmem>>, vector<1x1x2x128xf32>
    %244 = vector.shape_cast %243 : vector<1x1x2x128xf32> to vector<2x128xf32>
    %cst_221 = arith.constant dense<0.000000e+00> : vector<2x128xf32>
    %245 = vector.multi_reduction <add>, %242, %cst_221 [1] : vector<2x2x128xf32> to vector<2x128xf32>
    %246 = arith.addf %244, %245 : vector<2x128xf32>
    %c0_222 = arith.constant 0 : index
    %c21_223 = arith.constant 21 : index
    %c0_224 = arith.constant 0 : index
    %c0_225 = arith.constant 0 : index
    %247 = vector.load %arg8[%c0_222, %c21_223, %c0_224, %c0_225] : memref<1x27x2x128xf32, #tpu.memory_space<vmem>>, vector<1x1x2x128xf32>
    %248 = vector.shape_cast %247 : vector<1x1x2x128xf32> to vector<2x128xf32>
    %249 = vector.shape_cast %246 : vector<2x128xf32> to vector<1x1x2x128xf32>
    tpu.vector_store %arg8[%c0_222, %c21_223, %c0_224, %c0_225], %249 {strides = array<i32>} : memref<1x27x2x128xf32, #tpu.memory_space<vmem>>, vector<1x1x2x128xf32>,
    %250 = arith.subf %225, %3 : vector<2x2x128xf32>
    %251 = math.absf %250 : vector<2x2x128xf32>
    %c0_226 = arith.constant 0 : index
    %c22 = arith.constant 22 : index
    %c0_227 = arith.constant 0 : index
    %c0_228 = arith.constant 0 : index
    %252 = vector.load %arg8[%c0_226, %c22, %c0_227, %c0_228] : memref<1x27x2x128xf32, #tpu.memory_space<vmem>>, vector<1x1x2x128xf32>
    %253 = vector.shape_cast %252 : vector<1x1x2x128xf32> to vector<2x128xf32>
    %cst_229 = arith.constant dense<0.000000e+00> : vector<2x128xf32>
    %254 = vector.multi_reduction <add>, %251, %cst_229 [1] : vector<2x2x128xf32> to vector<2x128xf32>
    %255 = arith.addf %253, %254 : vector<2x128xf32>
    %c0_230 = arith.constant 0 : index
    %c22_231 = arith.constant 22 : index
    %c0_232 = arith.constant 0 : index
    %c0_233 = arith.constant 0 : index
    %256 = vector.load %arg8[%c0_230, %c22_231, %c0_232, %c0_233] : memref<1x27x2x128xf32, #tpu.memory_space<vmem>>, vector<1x1x2x128xf32>
    %257 = vector.shape_cast %256 : vector<1x1x2x128xf32> to vector<2x128xf32>
    %258 = vector.shape_cast %255 : vector<2x128xf32> to vector<1x1x2x128xf32>
    tpu.vector_store %arg8[%c0_230, %c22_231, %c0_232, %c0_233], %258 {strides = array<i32>} : memref<1x27x2x128xf32, #tpu.memory_space<vmem>>, vector<1x1x2x128xf32>,
    %259 = arith.mulf %3, %228 : vector<2x2x128xf32>
    %260 = arith.mulf %5, %233 : vector<2x2x128xf32>
    %261 = arith.addf %259, %260 : vector<2x2x128xf32>
    %c0_234 = arith.constant 0 : index
    %c23 = arith.constant 23 : index
    %c0_235 = arith.constant 0 : index
    %c0_236 = arith.constant 0 : index
    %262 = vector.load %arg8[%c0_234, %c23, %c0_235, %c0_236] : memref<1x27x2x128xf32, #tpu.memory_space<vmem>>, vector<1x1x2x128xf32>
    %263 = vector.shape_cast %262 : vector<1x1x2x128xf32> to vector<2x128xf32>
    %cst_237 = arith.constant dense<0.000000e+00> : vector<2x128xf32>
    %264 = vector.multi_reduction <add>, %261, %cst_237 [1] : vector<2x2x128xf32> to vector<2x128xf32>
    %265 = arith.addf %263, %264 : vector<2x128xf32>
    %c0_238 = arith.constant 0 : index
    %c23_239 = arith.constant 23 : index
    %c0_240 = arith.constant 0 : index
    %c0_241 = arith.constant 0 : index
    %266 = vector.load %arg8[%c0_238, %c23_239, %c0_240, %c0_241] : memref<1x27x2x128xf32, #tpu.memory_space<vmem>>, vector<1x1x2x128xf32>
    %267 = vector.shape_cast %266 : vector<1x1x2x128xf32> to vector<2x128xf32>
    %268 = vector.shape_cast %265 : vector<2x128xf32> to vector<1x1x2x128xf32>
    tpu.vector_store %arg8[%c0_238, %c23_239, %c0_240, %c0_241], %268 {strides = array<i32>} : memref<1x27x2x128xf32, #tpu.memory_space<vmem>>, vector<1x1x2x128xf32>,
    %c0_242 = arith.constant 0 : index
    %c24 = arith.constant 24 : index
    %c0_243 = arith.constant 0 : index
    %c0_244 = arith.constant 0 : index
    %269 = vector.load %arg8[%c0_242, %c24, %c0_243, %c0_244] : memref<1x27x2x128xf32, #tpu.memory_space<vmem>>, vector<1x1x2x128xf32>
    %270 = vector.shape_cast %269 : vector<1x1x2x128xf32> to vector<2x128xf32>
    %cst_245 = arith.constant dense<0.000000e+00> : vector<2x128xf32>
    %271 = vector.multi_reduction <add>, %225, %cst_245 [1] : vector<2x2x128xf32> to vector<2x128xf32>
    %272 = arith.addf %270, %271 : vector<2x128xf32>
    %c0_246 = arith.constant 0 : index
    %c24_247 = arith.constant 24 : index
    %c0_248 = arith.constant 0 : index
    %c0_249 = arith.constant 0 : index
    %273 = vector.load %arg8[%c0_246, %c24_247, %c0_248, %c0_249] : memref<1x27x2x128xf32, #tpu.memory_space<vmem>>, vector<1x1x2x128xf32>
    %274 = vector.shape_cast %273 : vector<1x1x2x128xf32> to vector<2x128xf32>
    %275 = vector.shape_cast %272 : vector<2x128xf32> to vector<1x1x2x128xf32>
    tpu.vector_store %arg8[%c0_246, %c24_247, %c0_248, %c0_249], %275 {strides = array<i32>} : memref<1x27x2x128xf32, #tpu.memory_space<vmem>>, vector<1x1x2x128xf32>,
    return
  }
  func.func @transform_0(%arg0: i32, %arg1: i32) -> (i32, i32, i32) {
    %c1_i32 = arith.constant 1 : i32
    %0 = arith.muli %arg0, %c1_i32 : i32
    %1 = arith.addi %0, %arg1 : i32
    %c0_i32 = arith.constant 0 : i32
    %c0_i32_0 = arith.constant 0 : i32
    %c0_i32_1 = arith.constant 0 : i32
    return %c0_i32, %1, %c0_i32_0 : i32, i32, i32
  }
  func.func @transform_1(%arg0: i32, %arg1: i32) -> (i32, i32, i32) {
    %c1_i32 = arith.constant 1 : i32
    %0 = arith.muli %arg0, %c1_i32 : i32
    %1 = arith.addi %0, %arg1 : i32
    %c0_i32 = arith.constant 0 : i32
    %c0_i32_0 = arith.constant 0 : i32
    %c0_i32_1 = arith.constant 0 : i32
    return %c0_i32, %1, %c0_i32_0 : i32, i32, i32
  }
  func.func @transform_2(%arg0: i32, %arg1: i32) -> (i32, i32, i32) {
    %c1_i32 = arith.constant 1 : i32
    %0 = arith.muli %arg0, %c1_i32 : i32
    %1 = arith.addi %0, %arg1 : i32
    %c0_i32 = arith.constant 0 : i32
    %c0_i32_0 = arith.constant 0 : i32
    %c0_i32_1 = arith.constant 0 : i32
    return %c0_i32, %1, %c0_i32_0 : i32, i32, i32
  }
  func.func @transform_3(%arg0: i32, %arg1: i32) -> (i32, i32, i32) {
    %c1_i32 = arith.constant 1 : i32
    %0 = arith.muli %arg0, %c1_i32 : i32
    %1 = arith.addi %0, %arg1 : i32
    %c0_i32 = arith.constant 0 : i32
    %c0_i32_0 = arith.constant 0 : i32
    %c0_i32_1 = arith.constant 0 : i32
    return %c0_i32, %1, %c0_i32_0 : i32, i32, i32
  }
  func.func @transform_4(%arg0: i32, %arg1: i32) -> (i32, i32, i32) {
    %c1_i32 = arith.constant 1 : i32
    %0 = arith.muli %arg0, %c1_i32 : i32
    %1 = arith.addi %0, %arg1 : i32
    %c0_i32 = arith.constant 0 : i32
    %c0_i32_0 = arith.constant 0 : i32
    %c0_i32_1 = arith.constant 0 : i32
    return %c0_i32, %1, %c0_i32_0 : i32, i32, i32
  }
  func.func @transform_5(%arg0: i32, %arg1: i32) -> (i32, i32, i32) {
    %c1_i32 = arith.constant 1 : i32
    %0 = arith.muli %arg0, %c1_i32 : i32
    %1 = arith.addi %0, %arg1 : i32
    %c0_i32 = arith.constant 0 : i32
    %c0_i32_0 = arith.constant 0 : i32
    %c0_i32_1 = arith.constant 0 : i32
    return %c0_i32, %1, %c0_i32_0 : i32, i32, i32
  }
  func.func @transform_6(%arg0: i32, %arg1: i32) -> (i32, i32, i32, i32) {
    %c0_i32 = arith.constant 0 : i32
    %c0_i32_0 = arith.constant 0 : i32
    %c0_i32_1 = arith.constant 0 : i32
    %c0_i32_2 = arith.constant 0 : i32
    return %arg0, %c0_i32, %c0_i32_0, %c0_i32_1 : i32, i32, i32, i32
  }
}

</mosaic_0001>

<bundles_post_ra>
// kernel: loss_doc_forward.1
= control target key start
LH: loop header
LB: loop body
LE: loop exit
PB: predicated region body
PF: predicated region fallthrough
CT: control target
= control target key end

     0   :  { %vm164_vm0 = vcmask 1041408   ;;  %v1042_v0 = vmov 0.0   ;;  %vm181_vm1 = vcmask 1041409   ;;  %s1627_s6 = inlined_call_operand.vmem [shape: f32[1,27,2,128], index: 6, kind: output, shape index: {}]   ;;  %s1628_s0 = inlined_call_operand.vmem [shape: f32[2,2,128], index: 0, kind: input, shape index: {}]   ;;  %s1629_s1 = inlined_call_operand.vmem [shape: f32[2,2,128], index: 1, kind: input, shape index: {}]   ;;  %s1630_s2 = inlined_call_operand.vmem [shape: f32[2,2,128], index: 2, kind: input, shape index: {}]   ;;  %s1631_s3 = inlined_call_operand.vmem [shape: f32[2,2,128], index: 3, kind: input, shape index: {}]   ;;  %s1632_s4 = inlined_call_operand.vmem [shape: f32[2,2,128], index: 4, kind: input, shape index: {}]   ;;  %s1633_s5 = inlined_call_operand.vmem [shape: f32[2,2,128], index: 5, kind: input, shape index: {}]  }
   0x1   :  { %129 = vst [vmem:[%s1627_s6] sm:$0x3] %v1042_v0  ;;  %v1085_v1 = vld [vmem:[%s1628_s0] sm:$0x3]  ;;  %v1090_v2 = vld [vmem:[%s1628_s0 + $0x2] sm:$0x3] }
   0x2   :  { %130 = vst [vmem:[%s1627_s6 + $0x2] sm:$0x3] %v1042_v0  ;;  %v160_v3 = vmul.f32 %v1085_v1, %v1085_v1  ;;  %v161_v4 = vmul.f32 %v1090_v2, %v1090_v2  ;;  %v188_v5 = vsel %vm164_vm0, %v1085_v1, 0.0  ;;  %v195_v6 = vsel %vm164_vm0, %v1090_v2, 0.0  ;;  %v1107_v7 = vld [vmem:[%s1629_s1] sm:$0x3] }
   0x3   :  { %131 = vst [vmem:[%s1627_s6 + $0x4] sm:$0x3] %v1042_v0  ;;  %v189_v8 = vrot.slane %v188_v5, 4  ;;  %v196_v9 = vrot.slane %v195_v6, 4  ;;  %v1116_v10 = vld [vmem:[%s1629_s1 + $0x2] sm:$0x3]  ;;  %v224_v11 = vmul.f32 %v1107_v7, %v1085_v1  ;;  %v247_v12 = vmul.f32 %v1107_v7, %v1107_v7 }
   0x4   :  { %132 = vst [vmem:[%s1627_s6 + $0x6] sm:$0x3] %v1042_v0  ;;  %v165_v13 = vsel %vm164_vm0, %v160_v3, 0.0  ;;  %v172_v14 = vsel %vm164_vm0, %v161_v4, 0.0  ;;  %v225_v15 = vmul.f32 %v1116_v10, %v1090_v2  ;;  %v248_v16 = vmul.f32 %v1116_v10, %v1116_v10 }
   0x5   :  { %133 = vst [vmem:[%s1627_s6 + $0x8] sm:$0x3] %v1042_v0  ;;  %v166_v17 = vrot.slane %v165_v13, 4  ;;  %v173_v18 = vrot.slane %v172_v14, 4  ;;  %v190_v19 = vadd.f32 %v189_v8, %v188_v5  ;;  %v197_v20 = vadd.f32 %v196_v9, %v195_v6 }
   0x6   :  { %134 = vst [vmem:[%s1627_s6 + $0xa] sm:$0x3] %v1042_v0  ;;  %v227_v21 = vsel %vm164_vm0, %v224_v11, 0.0  ;;  %v234_v22 = vsel %vm164_vm0, %v225_v15, 0.0  ;;  %v251_v23 = vsel %vm164_vm0, %v247_v12, 0.0  ;;  %v258_v24 = vsel %vm164_vm0, %v248_v16, 0.0 }
   0x7   :  { %135 = vst [vmem:[%s1627_s6 + $0xc] sm:$0x3] %v1042_v0  ;;  %v167_v25 = vadd.f32 %v166_v17, %v165_v13  ;;  %v174_v26 = vadd.f32 %v173_v18, %v172_v14  ;;  %v191_v27 = vrot.slane %v190_v19, 2  ;;  %v198_v28 = vrot.slane %v197_v20, 2 }
   0x8   :  { %136 = vst [vmem:[%s1627_s6 + $0xe] sm:$0x3] %v1042_v0  ;;  %v228_v29 = vrot.slane %v227_v21, 4  ;;  %v235_v30 = vrot.slane %v234_v22, 4  ;;  %v271_v31 = vsub.f32 %v1107_v7, %v1085_v1  ;;  %v272_v32 = vsub.f32 %v1116_v10, %v1090_v2  ;;  %v226_v9 = vld [vmem:[%s1627_s6] sm:$0x3] }
   0x9   :  { %137 = vst [vmem:[%s1627_s6 + $0x10] sm:$0x3] %v1042_v0  ;;  %v168_v33 = vrot.slane %v167_v25, 2  ;;  %v175_v34 = vrot.slane %v174_v26, 2  ;;  %v192_v35 = vadd.f32 %v191_v27, %v190_v19  ;;  %v199_v36 = vadd.f32 %v198_v28, %v197_v20  ;;  %v951_v19 = vld [vmem:[%s1627_s6 + $0x2] sm:$0x3] }
   0xa   :  { %138 = vst [vmem:[%s1627_s6 + $0x12] sm:$0x3] %v1042_v0  ;;  %v229_v37 = vadd.f32 %v228_v29, %v227_v21  ;;  %v236_v38 = vadd.f32 %v235_v30, %v234_v22  ;;  %v252_v39 = vrot.slane %v251_v23, 4  ;;  %v259_v40 = vrot.slane %v258_v24, 4 }
   0xb   :  { %139 = vst [vmem:[%s1627_s6 + $0x14] sm:$0x3] %v1042_v0  ;;  %v169_v41 = vadd.f32 %v168_v33, %v167_v25  ;;  %v176_v42 = vadd.f32 %v175_v34, %v174_v26  ;;  %v193_v43 = vrot.slane %v192_v35, 1  ;;  %v200_v44 = vrot.slane %v199_v36, 1  ;;  %v1247_v33 = vld [vmem:[%s1630_s2] sm:$0x3] }
   0xc   :  { %140 = vst [vmem:[%s1627_s6 + $0x16] sm:$0x3] %v1042_v0  ;;  %v230_v45 = vrot.slane %v229_v37, 2  ;;  %v237_v46 = vrot.slane %v236_v38, 2  ;;  %v253_v47 = vadd.f32 %v252_v39, %v251_v23  ;;  %v260_v48 = vadd.f32 %v259_v40, %v258_v24 }
   0xd   :  { %141 = vst [vmem:[%s1627_s6 + $0x18] sm:$0x3] %v1042_v0  ;;  %v170_v49 = vrot.slane %v169_v41, 1  ;;  %v177_v50 = vrot.slane %v176_v42, 1  ;;  %v194_v51 = vadd.f32 %v193_v43, %v192_v35  ;;  %v201_v52 = vadd.f32 %v200_v44, %v199_v36  ;;  %v1258_v35 = vld [vmem:[%s1630_s2 + $0x2] sm:$0x3] }
   0xe   :  { %142 = vst [vmem:[%s1627_s6 + $0x1a] sm:$0x3] %v1042_v0  ;;  %v231_v53 = vadd.f32 %v230_v45, %v229_v37  ;;  %v238_v54 = vadd.f32 %v237_v46, %v236_v38  ;;  %v254_v55 = vrot.slane %v253_v47, 2  ;;  %v261_v56 = vrot.slane %v260_v48, 2 }
   0xf   :  { %143 = vst [vmem:[%s1627_s6 + $0x1c] sm:$0x3] %v1042_v0  ;;  %v171_v57 = vadd.f32 %v170_v49, %v169_v41  ;;  %v178_v58 = vadd.f32 %v177_v50, %v176_v42  ;;  %v1185_v59 = vsel %vm181_vm1, %v201_v52, %v194_v51  ;;  %v273_v60 = vand.u32 2147483647, %v271_v31 }
  0x10   :  { %144 = vst [vmem:[%s1627_s6 + $0x1e] sm:$0x3] %v1042_v0  ;;  %v232_v61 = vrot.slane %v231_v53, 1  ;;  %v239_v62 = vrot.slane %v238_v54, 1  ;;  %v255_v63 = vadd.f32 %v254_v55, %v253_v47  ;;  %v262_v3 = vadd.f32 %v261_v56, %v260_v48 }
  0x11   :  { %145 = vst [vmem:[%s1627_s6 + $0x20] sm:$0x3] %v1042_v0  ;;  %v1196_v4 = vsel %vm181_vm1, %v178_v58, %v171_v57  ;;  %v274_v5 = vand.u32 2147483647, %v272_v32  ;;  %v277_v6 = vsel %vm164_vm0, %v273_v60, 0.0  ;;  %v1200_v8 = vsub.f32 1.0, %v1085_v1 }
  0x12   :  { %146 = vst [vmem:[%s1627_s6 + $0x22] sm:$0x3] %v1042_v0  ;;  %v233_v11 = vadd.f32 %v232_v61, %v231_v53  ;;  %v240_v12 = vadd.f32 %v239_v62, %v238_v54  ;;  %v256_v13 = vrot.slane %v255_v63, 1  ;;  %v263_v14 = vrot.slane %v262_v3, 1  ;;  %v953_v60 = vld [vmem:[%s1627_s6 + $0x4] sm:$0x3] }
  0x13   :  { %147 = vst [vmem:[%s1627_s6 + $0x24] sm:$0x3] %v1042_v0  ;;  %v278_v15 = vrot.slane %v277_v6, 4  ;;  %v284_v16 = vsel %vm164_vm0, %v274_v5, 0.0  ;;  %v1215_v17 = vsub.f32 1.0, %v1090_v2  ;;  %1000 = vlog2.f32 %v1107_v7 }
  0x14   :  { %148 = vst [vmem:[%s1627_s6 + $0x26] sm:$0x3] %v1042_v0  ;;  %v243_v18 = vsel %vm181_vm1, %v240_v12, %v233_v11  ;;  %v257_v20 = vadd.f32 %v256_v13, %v255_v63  ;;  %v264_v21 = vadd.f32 %v263_v14, %v262_v3  ;;  %v285_v22 = vrot.slane %v284_v16, 4 }
  0x15   :  { %149 = vst [vmem:[%s1627_s6 + $0x28] sm:$0x3] %v1042_v0  ;;  %v245_v23 = vadd.f32 %v243_v18, %v226_v9  ;;  %v279_v24 = vadd.f32 %v278_v15, %v277_v6  ;;  %1002 = vlog2.f32 %v1116_v10  ;;  %v216_v25 = vsub.f32 1.0, %v1107_v7 }
  0x16   :  { %150 = vst [vmem:[%s1627_s6 + $0x2a] sm:$0x3] %v1042_v0  ;;  %v267_v26 = vsel %vm181_vm1, %v264_v21, %v257_v20  ;;  %v286_v27 = vadd.f32 %v285_v22, %v284_v16  ;;  %v217_v28 = vsub.f32 1.0, %v1116_v10  ;;  %v327_v29 = vsel %vm164_vm0, %v1107_v7, 0.0 }
  0x17   :  { %151 = vst [vmem:[%s1627_s6 + $0x2c] sm:$0x3] %v1042_v0  ;;  %v269_v30 = vadd.f32 %v951_v19, %v267_v26  ;;  %v280_v31 = vrot.slane %v279_v24, 2  ;;  %1004 = vlog2.f32 %v216_v25  ;;  %v328_v32 = vrot.slane %v327_v29, 4 }
  0x18   :  { %152 = vst [vmem:[%s1627_s6 + $0x2e] sm:$0x3] %v1042_v0  ;;  %v287_v7 = vrot.slane %v286_v27, 2  ;;  %1006 = vlog2.f32 %v217_v28  ;;  %v334_v34 = vsel %vm164_vm0, %v1116_v10, 0.0  ;;  %v363_v36 = vmul.f32 %v1247_v33, %v1085_v1 }
  0x19   :  { %v1001_v37 = vpop.eup %1000  ;;  %153 = vst [vmem:[%s1627_s6 + $0x30] sm:$0x3] %v1042_v0  ;;  %v281_v38 = vadd.f32 %v280_v31, %v279_v24  ;;  %v329_v39 = vadd.f32 %v328_v32, %v327_v29  ;;  %v335_v40 = vrot.slane %v334_v34, 4  ;;  %v364_v10 = vmul.f32 %v1258_v35, %v1090_v2 }
  0x1a   :  { %154 = vst [vmem:[%s1627_s6 + $0x32] sm:$0x3] %v1042_v0  ;;  %v288_v41 = vadd.f32 %v287_v7, %v286_v27  ;;  %v211_v42 = vmul.f32 0.6931472, %v1001_v37  ;;  %v367_v43 = vsel %vm164_vm0, %v363_v36, 0.0  ;;  %v387_v44 = vmul.f32 %v1247_v33, %v1247_v33 }
  0x1b   :  { %v1003_v45 = vpop.eup %1002  ;;  %155 = vst [vmem:[%s1627_s6 + $0x34] sm:$0x3] %v1042_v0  ;;  %v282_v46 = vrot.slane %v281_v38, 1  ;;  %v330_v47 = vrot.slane %v329_v39, 2  ;;  %v336_v48 = vadd.f32 %v335_v40, %v334_v34  ;;  %v368_v49 = vrot.slane %v367_v43, 4 }
  0x1c   :  { %246 = vst [vmem:[%s1627_s6] sm:$0x3] %v245_v23  ;;  %v289_v50 = vrot.slane %v288_v41, 1  ;;  %v213_v51 = vmul.f32 0.6931472, %v1003_v45  ;;  %v214_v52 = vmax.f32 %v211_v42, -100.0  ;;  %v374_v53 = vsel %vm164_vm0, %v364_v10, 0.0 }
  0x1d   :  { %v1005_v54 = vpop.eup %1004  ;;  %952 = vst [vmem:[%s1627_s6 + $0x2] sm:$0x3] %v269_v30  ;;  %v283_v55 = vadd.f32 %v282_v46, %v281_v38  ;;  %v331_v0 = vadd.f32 %v330_v47, %v329_v39  ;;  %v337_v56 = vrot.slane %v336_v48, 2  ;;  %v369_v57 = vadd.f32 %v368_v49, %v367_v43 }
  0x1e   :  { %v1007_v58 = vpop.eup %1006  ;;  %v290_v61 = vadd.f32 %v289_v50, %v288_v41  ;;  %v215_v62 = vmax.f32 %v213_v51, -100.0  ;;  %v219_v63 = vmul.f32 0.6931472, %v1005_v54  ;;  %v297_v3 = vmul.f32 %v214_v52, %v1085_v1  ;;  %v959_v54 = vld [vmem:[%s1627_s6 + $0xa] sm:$0x3] }
  0x1f   :  { %v221_v5 = vmul.f32 0.6931472, %v1007_v58  ;;  %v332_v6 = vrot.slane %v331_v0, 1  ;;  %v338_v9 = vadd.f32 %v337_v56, %v336_v48  ;;  %v370_v11 = vrot.slane %v369_v57, 2 }
  0x20   :  { %v293_v12 = vsel %vm181_vm1, %v290_v61, %v283_v55  ;;  %v222_v13 = vmax.f32 %v219_v63, -100.0  ;;  %v298_v14 = vmul.f32 %v215_v62, %v1090_v2  ;;  %v375_v15 = vrot.slane %v374_v53, 4 }
  0x21   :  { %v947_v16 = vld [vmem:[%s1627_s6 + $0x32] sm:$0x3]  ;;  %v295_v18 = vadd.f32 %v953_v60, %v293_v12  ;;  %v223_v19 = vmax.f32 %v221_v5, -100.0  ;;  %v333_v20 = vadd.f32 %v332_v6, %v331_v0  ;;  %v339_v21 = vrot.slane %v338_v9, 1 }
  0x22   :  { %v184_v22 = vadd.f32 %v947_v16, %v1196_v4  ;;  %v949_v23 = vld [vmem:[%s1627_s6 + $0x34] sm:$0x3]  ;;  %v299_v24 = vmul.f32 %v222_v13, %v1200_v8  ;;  %v371_v25 = vadd.f32 %v370_v11, %v369_v57  ;;  %v376_v26 = vadd.f32 %v375_v15, %v374_v53  ;;  %v957_v4 = vld [vmem:[%s1627_s6 + $0x8] sm:$0x3] }
  0x23   :  { %v206_v27 = vadd.f32 %v949_v23, %v1185_v59  ;;  %954 = vst [vmem:[%s1627_s6 + $0x4] sm:$0x3] %v295_v18  ;;  %v300_v28 = vmul.f32 %v223_v19, %v1215_v17  ;;  %v340_v29 = vadd.f32 %v339_v21, %v338_v9  ;;  %v388_v30 = vmul.f32 %v1258_v35, %v1258_v35 }
  0x24   :  { %948 = vst [vmem:[%s1627_s6 + $0x32] sm:$0x3] %v184_v22  ;;  %v301_v31 = vadd.f32 %v299_v24, %v297_v3  ;;  %v372_v59 = vrot.slane %v371_v25, 1  ;;  %v377_v32 = vrot.slane %v376_v26, 2  ;;  %v391_v7 = vsel %vm164_vm0, %v387_v44, 0.0 }
  0x25   :  { %950 = vst [vmem:[%s1627_s6 + $0x34] sm:$0x3] %v206_v27  ;;  %v302_v34 = vadd.f32 %v300_v28, %v298_v14  ;;  %v343_v36 = vsel %vm181_vm1, %v340_v29, %v333_v20  ;;  %v392_v37 = vrot.slane %v391_v7, 4  ;;  %v398_v38 = vsel %vm164_vm0, %v388_v30, 0.0  ;;  %v961_v28 = vld [vmem:[%s1627_s6 + $0xc] sm:$0x3] }
  0x26   :  { %v305_v39 = vsel %vm164_vm0, %v301_v31, 0.0  ;;  %v345_v40 = vadd.f32 %v957_v4, %v343_v36  ;;  %v373_v10 = vadd.f32 %v372_v59, %v371_v25  ;;  %v378_v41 = vadd.f32 %v377_v32, %v376_v26  ;;  %v955_v30 = vld [vmem:[%s1627_s6 + $0x6] sm:$0x3] }
  0x27   :  { %v306_v42 = vrot.slane %v305_v39, 4  ;;  %v312_v43 = vsel %vm164_vm0, %v302_v34, 0.0  ;;  %v393_v45 = vadd.f32 %v392_v37, %v391_v7  ;;  %v399_v44 = vrot.slane %v398_v38, 4 }
  0x28   :  { %v313_v46 = vrot.slane %v312_v43, 4  ;;  %958 = vst [vmem:[%s1627_s6 + $0x8] sm:$0x3] %v345_v40  ;;  %v379_v47 = vrot.slane %v378_v41, 1  ;;  %v411_v48 = vsub.f32 %v1247_v33, %v1085_v1  ;;  %v412_v49 = vsub.f32 %v1258_v35, %v1090_v2 }
  0x29   :  { %v307_v50 = vadd.f32 %v306_v42, %v305_v39  ;;  %v394_v51 = vrot.slane %v393_v45, 2  ;;  %v400_v52 = vadd.f32 %v399_v44, %v398_v38  ;;  %1008 = vlog2.f32 %v1247_v33  ;;  %v1360_v44 = vld [vmem:[%s1631_s3 + $0x2] sm:$0x3] }
  0x2a   :  { %v314_v53 = vadd.f32 %v313_v46, %v312_v43  ;;  %v380_v55 = vadd.f32 %v379_v47, %v378_v41  ;;  %v413_v0 = vand.u32 2147483647, %v411_v48  ;;  %v414_v56 = vand.u32 2147483647, %v412_v49 }
  0x2b   :  { %v308_v57 = vrot.slane %v307_v50, 2  ;;  %v395_v58 = vadd.f32 %v394_v51, %v393_v45  ;;  %v401_v60 = vrot.slane %v400_v52, 2  ;;  %1010 = vlog2.f32 %v1258_v35  ;;  %v1355_v45 = vld [vmem:[%s1631_s3] sm:$0x3] }
  0x2c   :  { %v315_v61 = vrot.slane %v314_v53, 2  ;;  %v383_v62 = vsel %vm181_vm1, %v380_v55, %v373_v10  ;;  %v417_v63 = vsel %vm164_vm0, %v413_v0, 0.0  ;;  %v424_v3 = vsel %vm164_vm0, %v414_v56, 0.0  ;;  %v963_v55 = vld [vmem:[%s1627_s6 + $0xe] sm:$0x3] }
  0x2d   :  { %v309_v5 = vadd.f32 %v308_v57, %v307_v50  ;;  %v385_v6 = vadd.f32 %v959_v54, %v383_v62  ;;  %v396_v9 = vrot.slane %v395_v58, 1  ;;  %v402_v11 = vadd.f32 %v401_v60, %v400_v52 }
  0x2e   :  { %v316_v12 = vadd.f32 %v315_v61, %v314_v53  ;;  %v418_v13 = vrot.slane %v417_v63, 4  ;;  %v425_v14 = vrot.slane %v424_v3, 4  ;;  %v355_v15 = vsub.f32 1.0, %v1247_v33 }
  0x2f   :  { %v1009_v16 = vpop.eup %1008  ;;  %v310_v18 = vrot.slane %v309_v5, 1  ;;  %960 = vst [vmem:[%s1627_s6 + $0xa] sm:$0x3] %v385_v6  ;;  %v397_v19 = vadd.f32 %v396_v9, %v395_v58  ;;  %v403_v20 = vrot.slane %v402_v11, 1  ;;  %v356_v21 = vsub.f32 1.0, %v1258_v35 }
  0x30   :  { %v317_v22 = vrot.slane %v316_v12, 1  ;;  %v419_v23 = vadd.f32 %v418_v13, %v417_v63  ;;  %v426_v24 = vadd.f32 %v425_v14, %v424_v3  ;;  %v350_v25 = vmul.f32 0.6931472, %v1009_v16 }
  0x31   :  { %v1011_v26 = vpop.eup %1010  ;;  %v311_v27 = vadd.f32 %v310_v18, %v309_v5  ;;  %v404_v4 = vadd.f32 %v403_v20, %v402_v11  ;;  %1012 = vlog2.f32 %v355_v15  ;;  %v467_v29 = vsel %vm164_vm0, %v1247_v33, 0.0 }
  0x32   :  { %v318_v31 = vadd.f32 %v317_v22, %v316_v12  ;;  %v420_v59 = vrot.slane %v419_v23, 2  ;;  %v427_v32 = vrot.slane %v426_v24, 2  ;;  %v352_v7 = vmul.f32 0.6931472, %v1011_v26 }
  0x33   :  { %v407_v34 = vsel %vm181_vm1, %v404_v4, %v397_v19  ;;  %v353_v36 = vmax.f32 %v350_v25, -100.0  ;;  %1014 = vlog2.f32 %v356_v21  ;;  %v468_v37 = vrot.slane %v467_v29, 4 }
  0x34   :  { %v321_v38 = vsel %vm181_vm1, %v318_v31, %v311_v27  ;;  %v409_v39 = vadd.f32 %v961_v28, %v407_v34  ;;  %v421_v40 = vadd.f32 %v420_v59, %v419_v23  ;;  %v428_v10 = vadd.f32 %v427_v32, %v426_v24 }
  0x35   :  { %v323_v41 = vadd.f32 %v955_v30, %v321_v38  ;;  %v354_v33 = vmax.f32 %v352_v7, -100.0  ;;  %v437_v42 = vmul.f32 %v353_v36, %v1085_v1  ;;  %v469_v43 = vadd.f32 %v468_v37, %v467_v29  ;;  %v967_v36 = vld [vmem:[%s1627_s6 + $0x12] sm:$0x3] }
  0x36   :  { %962 = vst [vmem:[%s1627_s6 + $0xc] sm:$0x3] %v409_v39  ;;  %v422_v46 = vrot.slane %v421_v40, 1  ;;  %v429_v47 = vrot.slane %v428_v10, 1  ;;  %v474_v48 = vsel %vm164_vm0, %v1258_v35, 0.0  ;;  %v503_v49 = vmul.f32 %v1355_v45, %v1085_v1 }
  0x37   :  { %v1013_v50 = vpop.eup %1012  ;;  %956 = vst [vmem:[%s1627_s6 + $0x6] sm:$0x3] %v323_v41  ;;  %v438_v51 = vmul.f32 %v354_v33, %v1090_v2  ;;  %v470_v52 = vrot.slane %v469_v43, 2  ;;  %v475_v53 = vrot.slane %v474_v48, 4  ;;  %v504_v54 = vmul.f32 %v1360_v44, %v1090_v2 }
  0x38   :  { %v423_v35 = vadd.f32 %v422_v46, %v421_v40  ;;  %v430_v0 = vadd.f32 %v429_v47, %v428_v10  ;;  %v358_v56 = vmul.f32 0.6931472, %v1013_v50  ;;  %v507_v57 = vsel %vm164_vm0, %v503_v49, 0.0  ;;  %v969_v49 = vld [vmem:[%s1627_s6 + $0x14] sm:$0x3] }
  0x39   :  { %v1015_v58 = vpop.eup %1014  ;;  %v471_v60 = vadd.f32 %v470_v52, %v469_v43  ;;  %v476_v61 = vadd.f32 %v475_v53, %v474_v48  ;;  %v508_v62 = vrot.slane %v507_v57, 4  ;;  %v514_v63 = vsel %vm164_vm0, %v504_v54, 0.0 }
  0x3a   :  { %v433_v3 = vsel %vm181_vm1, %v430_v0, %v423_v35  ;;  %v360_v5 = vmul.f32 0.6931472, %v1015_v58  ;;  %v361_v6 = vmax.f32 %v358_v56, -100.0  ;;  %v515_v9 = vrot.slane %v514_v63, 4 }
  0x3b   :  { %v435_v11 = vadd.f32 %v963_v55, %v433_v3  ;;  %v472_v12 = vrot.slane %v471_v60, 1  ;;  %v477_v13 = vrot.slane %v476_v61, 2  ;;  %v509_v14 = vadd.f32 %v508_v62, %v507_v57 }
  0x3c   :  { %v362_v15 = vmax.f32 %v360_v5, -100.0  ;;  %v439_v16 = vmul.f32 %v361_v6, %v1200_v8  ;;  %v516_v18 = vadd.f32 %v515_v9, %v514_v63  ;;  %v527_v19 = vmul.f32 %v1355_v45, %v1355_v45 }
  0x3d   :  { %964 = vst [vmem:[%s1627_s6 + $0xe] sm:$0x3] %v435_v11  ;;  %v473_v20 = vadd.f32 %v472_v12, %v471_v60  ;;  %v478_v21 = vadd.f32 %v477_v13, %v476_v61  ;;  %v510_v22 = vrot.slane %v509_v14, 2  ;;  %v528_v23 = vmul.f32 %v1360_v44, %v1360_v44  ;;  %v971_v13 = vld [vmem:[%s1627_s6 + $0x16] sm:$0x3] }
  0x3e   :  { %v440_v24 = vmul.f32 %v362_v15, %v1215_v17  ;;  %v441_v25 = vadd.f32 %v439_v16, %v437_v42  ;;  %v517_v26 = vrot.slane %v516_v18, 2  ;;  %v531_v27 = vsel %vm164_vm0, %v527_v19, 0.0 }
  0x3f   :  { %v479_v28 = vrot.slane %v478_v21, 1  ;;  %v511_v4 = vadd.f32 %v510_v22, %v509_v14  ;;  %v532_v29 = vrot.slane %v531_v27, 4  ;;  %v538_v30 = vsel %vm164_vm0, %v528_v23, 0.0 }
  0x40   :  { %v442_v31 = vadd.f32 %v440_v24, %v438_v51  ;;  %v445_v59 = vsel %vm164_vm0, %v441_v25, 0.0  ;;  %v518_v32 = vadd.f32 %v517_v26, %v516_v18  ;;  %v539_v7 = vrot.slane %v538_v30, 4 }
  0x41   :  { %v446_v34 = vrot.slane %v445_v59, 4  ;;  %v480_v37 = vadd.f32 %v479_v28, %v478_v21  ;;  %v512_v38 = vrot.slane %v511_v4, 1  ;;  %v533_v39 = vadd.f32 %v532_v29, %v531_v27  ;;  %v965_v27 = vld [vmem:[%s1627_s6 + $0x10] sm:$0x3] }
  0x42   :  { %v452_v40 = vsel %vm164_vm0, %v442_v31, 0.0  ;;  %v519_v10 = vrot.slane %v518_v32, 1  ;;  %v540_v41 = vadd.f32 %v539_v7, %v538_v30  ;;  %v551_v33 = vsub.f32 %v1355_v45, %v1085_v1 }
  0x43   :  { %v447_v42 = vadd.f32 %v446_v34, %v445_v59  ;;  %v453_v43 = vrot.slane %v452_v40, 4  ;;  %v483_v46 = vsel %vm181_vm1, %v480_v37, %v473_v20  ;;  %v513_v47 = vadd.f32 %v512_v38, %v511_v4 }
  0x44   :  { %v485_v48 = vadd.f32 %v967_v36, %v483_v46  ;;  %v520_v50 = vadd.f32 %v519_v10, %v518_v32  ;;  %v534_v51 = vrot.slane %v533_v39, 2  ;;  %v541_v52 = vrot.slane %v540_v41, 2 }
  0x45   :  { %v448_v53 = vrot.slane %v447_v42, 2  ;;  %v454_v54 = vadd.f32 %v453_v43, %v452_v40  ;;  %v552_v55 = vsub.f32 %v1360_v44, %v1090_v2  ;;  %v553_v35 = vand.u32 2147483647, %v551_v33  ;;  %v1442_v43 = vld [vmem:[%s1632_s4 + $0x2] sm:$0x3] }
  0x46   :  { %968 = vst [vmem:[%s1627_s6 + $0x12] sm:$0x3] %v485_v48  ;;  %v523_v0 = vsel %vm181_vm1, %v520_v50, %v513_v47  ;;  %v535_v56 = vadd.f32 %v534_v51, %v533_v39  ;;  %v542_v57 = vadd.f32 %v541_v52, %v540_v41  ;;  %1016 = vlog2.f32 %v1355_v45  ;;  %v1436_v41 = vld [vmem:[%s1632_s4] sm:$0x3] }
  0x47   :  { %v449_v58 = vadd.f32 %v448_v53, %v447_v42  ;;  %v455_v60 = vrot.slane %v454_v54, 2  ;;  %v525_v61 = vadd.f32 %v969_v49, %v523_v0  ;;  %v554_v62 = vand.u32 2147483647, %v552_v55  ;;  %v973_v0 = vld [vmem:[%s1627_s6 + $0x18] sm:$0x3] }
  0x48   :  { %v536_v63 = vrot.slane %v535_v56, 1  ;;  %v543_v3 = vrot.slane %v542_v57, 1  ;;  %v557_v5 = vsel %vm164_vm0, %v553_v35, 0.0  ;;  %1018 = vlog2.f32 %v1360_v44 }
  0x49   :  { %v450_v6 = vrot.slane %v449_v58, 1  ;;  %v456_v9 = vadd.f32 %v455_v60, %v454_v54  ;;  %970 = vst [vmem:[%s1627_s6 + $0x14] sm:$0x3] %v525_v61  ;;  %v558_v11 = vrot.slane %v557_v5, 4  ;;  %v564_v12 = vsel %vm164_vm0, %v554_v62, 0.0 }
  0x4a   :  { %v537_v14 = vadd.f32 %v536_v63, %v535_v56  ;;  %v544_v15 = vadd.f32 %v543_v3, %v542_v57  ;;  %v565_v16 = vrot.slane %v564_v12, 4  ;;  %v495_v18 = vsub.f32 1.0, %v1355_v45 }
  0x4b   :  { %v451_v19 = vadd.f32 %v450_v6, %v449_v58  ;;  %v457_v20 = vrot.slane %v456_v9, 1  ;;  %v559_v21 = vadd.f32 %v558_v11, %v557_v5  ;;  %v496_v22 = vsub.f32 1.0, %v1360_v44 }
  0x4c   :  { %v1017_v23 = vpop.eup %1016  ;;  %v547_v24 = vsel %vm181_vm1, %v544_v15, %v537_v14  ;;  %v566_v25 = vadd.f32 %v565_v16, %v564_v12  ;;  %1020 = vlog2.f32 %v495_v18  ;;  %v607_v26 = vsel %vm164_vm0, %v1355_v45, 0.0 }
  0x4d   :  { %v458_v28 = vadd.f32 %v457_v20, %v456_v9  ;;  %v549_v4 = vadd.f32 %v971_v13, %v547_v24  ;;  %v560_v29 = vrot.slane %v559_v21, 2  ;;  %v490_v30 = vmul.f32 0.6931472, %v1017_v23 }
  0x4e   :  { %v1019_v31 = vpop.eup %1018  ;;  %v567_v59 = vrot.slane %v566_v25, 2  ;;  %1022 = vlog2.f32 %v496_v22  ;;  %v608_v32 = vrot.slane %v607_v26, 4  ;;  %v614_v7 = vsel %vm164_vm0, %v1360_v44, 0.0 }
  0x4f   :  { %v461_v34 = vsel %vm181_vm1, %v458_v28, %v451_v19  ;;  %972 = vst [vmem:[%s1627_s6 + $0x16] sm:$0x3] %v549_v4  ;;  %v561_v45 = vadd.f32 %v560_v29, %v559_v21  ;;  %v492_v36 = vmul.f32 0.6931472, %v1019_v31  ;;  %v493_v37 = vmax.f32 %v490_v30, -100.0 }
  0x50   :  { %v463_v38 = vadd.f32 %v965_v27, %v461_v34  ;;  %v568_v39 = vadd.f32 %v567_v59, %v566_v25  ;;  %v609_v40 = vadd.f32 %v608_v32, %v607_v26  ;;  %v615_v10 = vrot.slane %v614_v7, 4  ;;  %v977_v25 = vld [vmem:[%s1627_s6 + $0x1c] sm:$0x3] }
  0x51   :  { %v562_v33 = vrot.slane %v561_v45, 1  ;;  %v494_v44 = vmax.f32 %v492_v36, -100.0  ;;  %v577_v42 = vmul.f32 %v493_v37, %v1085_v1  ;;  %v643_v46 = vmul.f32 %v1436_v41, %v1085_v1 }
  0x52   :  { %v1021_v47 = vpop.eup %1020  ;;  %966 = vst [vmem:[%s1627_s6 + $0x10] sm:$0x3] %v463_v38  ;;  %v569_v48 = vrot.slane %v568_v39, 1  ;;  %v610_v49 = vrot.slane %v609_v40, 2  ;;  %v616_v50 = vadd.f32 %v615_v10, %v614_v7  ;;  %v644_v51 = vmul.f32 %v1442_v43, %v1090_v2 }
  0x53   :  { %v563_v52 = vadd.f32 %v562_v33, %v561_v45  ;;  %v498_v53 = vmul.f32 0.6931472, %v1021_v47  ;;  %v578_v54 = vmul.f32 %v494_v44, %v1090_v2  ;;  %v647_v55 = vsel %vm164_vm0, %v643_v46, 0.0 }
  0x54   :  { %v1023_v35 = vpop.eup %1022  ;;  %v570_v56 = vadd.f32 %v569_v48, %v568_v39  ;;  %v611_v57 = vadd.f32 %v610_v49, %v609_v40  ;;  %v617_v58 = vrot.slane %v616_v50, 2  ;;  %v648_v60 = vrot.slane %v647_v55, 4 }
  0x55   :  { %v500_v61 = vmul.f32 0.6931472, %v1023_v35  ;;  %v501_v62 = vmax.f32 %v498_v53, -100.0  ;;  %v654_v63 = vsel %vm164_vm0, %v644_v51, 0.0  ;;  %v667_v3 = vmul.f32 %v1436_v41, %v1436_v41 }
  0x56   :  { %v573_v5 = vsel %vm181_vm1, %v570_v56, %v563_v52  ;;  %v612_v6 = vrot.slane %v611_v57, 1  ;;  %v618_v9 = vadd.f32 %v617_v58, %v616_v50  ;;  %v649_v11 = vadd.f32 %v648_v60, %v647_v55  ;;  %v979_v52 = vld [vmem:[%s1627_s6 + $0x1e] sm:$0x3] }
  0x57   :  { %v575_v12 = vadd.f32 %v973_v0, %v573_v5  ;;  %v502_v13 = vmax.f32 %v500_v61, -100.0  ;;  %v579_v14 = vmul.f32 %v501_v62, %v1200_v8  ;;  %v655_v15 = vrot.slane %v654_v63, 4 }
  0x58   :  { %v613_v16 = vadd.f32 %v612_v6, %v611_v57  ;;  %v619_v18 = vrot.slane %v618_v9, 1  ;;  %v650_v19 = vrot.slane %v649_v11, 2  ;;  %v668_v20 = vmul.f32 %v1442_v43, %v1442_v43  ;;  %v1493_v6 = vld [vmem:[%s1633_s5] sm:$0x3] }
  0x59   :  { %974 = vst [vmem:[%s1627_s6 + $0x18] sm:$0x3] %v575_v12  ;;  %v580_v21 = vmul.f32 %v502_v13, %v1215_v17  ;;  %v581_v22 = vadd.f32 %v579_v14, %v577_v42  ;;  %v656_v23 = vadd.f32 %v655_v15, %v654_v63  ;;  %v671_v24 = vsel %vm164_vm0, %v667_v3, 0.0 }
  0x5a   :  { %v620_v26 = vadd.f32 %v619_v18, %v618_v9  ;;  %v651_v27 = vadd.f32 %v650_v19, %v649_v11  ;;  %v672_v28 = vrot.slane %v671_v24, 4  ;;  %v678_v4 = vsel %vm164_vm0, %v668_v20, 0.0  ;;  %v981_v9 = vld [vmem:[%s1627_s6 + $0x20] sm:$0x3] }
  0x5b   :  { %v582_v29 = vadd.f32 %v580_v21, %v578_v54  ;;  %v585_v30 = vsel %vm164_vm0, %v581_v22, 0.0  ;;  %v657_v31 = vrot.slane %v656_v23, 2  ;;  %v679_v59 = vrot.slane %v678_v4, 4 }
  0x5c   :  { %v586_v32 = vrot.slane %v585_v30, 4  ;;  %v623_v7 = vsel %vm181_vm1, %v620_v26, %v613_v16  ;;  %v652_v34 = vrot.slane %v651_v27, 1  ;;  %v673_v45 = vadd.f32 %v672_v28, %v671_v24  ;;  %v975_v26 = vld [vmem:[%s1627_s6 + $0x1a] sm:$0x3] }
  0x5d   :  { %v592_v36 = vsel %vm164_vm0, %v582_v29, 0.0  ;;  %v625_v37 = vadd.f32 %v977_v25, %v623_v7  ;;  %v658_v38 = vadd.f32 %v657_v31, %v656_v23  ;;  %v680_v39 = vadd.f32 %v679_v59, %v678_v4 }
  0x5e   :  { %v587_v40 = vadd.f32 %v586_v32, %v585_v30  ;;  %v593_v10 = vrot.slane %v592_v36, 4  ;;  %v653_v33 = vadd.f32 %v652_v34, %v651_v27  ;;  %v674_v44 = vrot.slane %v673_v45, 2 }
  0x5f   :  { %978 = vst [vmem:[%s1627_s6 + $0x1c] sm:$0x3] %v625_v37  ;;  %v659_v42 = vrot.slane %v658_v38, 1  ;;  %v681_v46 = vrot.slane %v680_v39, 2  ;;  %v691_v47 = vsub.f32 %v1436_v41, %v1085_v1  ;;  %v692_v48 = vsub.f32 %v1442_v43, %v1090_v2 }
  0x60   :  { %v588_v49 = vrot.slane %v587_v40, 2  ;;  %v594_v50 = vadd.f32 %v593_v10, %v592_v36  ;;  %v675_v51 = vadd.f32 %v674_v44, %v673_v45  ;;  %1024 = vlog2.f32 %v1436_v41 }
  0x61   :  { %v660_v53 = vadd.f32 %v659_v42, %v658_v38  ;;  %v682_v54 = vadd.f32 %v681_v46, %v680_v39  ;;  %v693_v55 = vand.u32 2147483647, %v691_v47  ;;  %v694_v35 = vand.u32 2147483647, %v692_v48  ;;  %v1525_v38 = vld [vmem:[%s1628_s0] sm:$0x3] }
  0x62   :  { %v589_v0 = vadd.f32 %v588_v49, %v587_v40  ;;  %v595_v56 = vrot.slane %v594_v50, 2  ;;  %v676_v57 = vrot.slane %v675_v51, 1  ;;  %1026 = vlog2.f32 %v1442_v43 }
  0x63   :  { %v663_v2 = vsel %vm181_vm1, %v660_v53, %v653_v33  ;;  %v683_v58 = vrot.slane %v682_v54, 1  ;;  %v697_v60 = vsel %vm164_vm0, %v693_v55, 0.0  ;;  %v704_v61 = vsel %vm164_vm0, %v694_v35, 0.0  ;;  %v983_v53 = vld [vmem:[%s1627_s6 + $0x22] sm:$0x3] }
  0x64   :  { %v590_v62 = vrot.slane %v589_v0, 1  ;;  %v596_v63 = vadd.f32 %v595_v56, %v594_v50  ;;  %v665_v3 = vadd.f32 %v979_v52, %v663_v2  ;;  %v677_v5 = vadd.f32 %v676_v57, %v675_v51 }
  0x65   :  { %v684_v11 = vadd.f32 %v683_v58, %v682_v54  ;;  %v698_v12 = vrot.slane %v697_v60, 4  ;;  %v705_v13 = vrot.slane %v704_v61, 4  ;;  %v635_v14 = vsub.f32 1.0, %v1436_v41 }
  0x66   :  { %v1025_v15 = vpop.eup %1024  ;;  %v591_v16 = vadd.f32 %v590_v62, %v589_v0  ;;  %v597_v18 = vrot.slane %v596_v63, 1  ;;  %980 = vst [vmem:[%s1627_s6 + $0x1e] sm:$0x3] %v665_v3  ;;  %v636_v19 = vsub.f32 1.0, %v1442_v43  ;;  %v783_v20 = vmul.f32 %v1493_v6, %v1085_v1 }
  0x67   :  { %v687_v21 = vsel %vm181_vm1, %v684_v11, %v677_v5  ;;  %v699_v22 = vadd.f32 %v698_v12, %v697_v60  ;;  %v706_v23 = vadd.f32 %v705_v13, %v704_v61  ;;  %v630_v24 = vmul.f32 0.6931472, %v1025_v15 }
  0x68   :  { %v1027_v25 = vpop.eup %1026  ;;  %v598_v27 = vadd.f32 %v597_v18, %v596_v63  ;;  %v689_v28 = vadd.f32 %v981_v9, %v687_v21  ;;  %1028 = vlog2.f32 %v635_v14  ;;  %v747_v4 = vsel %vm164_vm0, %v1436_v41, 0.0  ;;  %v1520_v41 = vld [vmem:[%s1633_s5 + $0x2] sm:$0x3] }
  0x69   :  { %v700_v29 = vrot.slane %v699_v22, 2  ;;  %v707_v30 = vrot.slane %v706_v23, 2  ;;  %v632_v31 = vmul.f32 0.6931472, %v1027_v25  ;;  %v633_v1 = vmax.f32 %v630_v24, -100.0 }
  0x6a   :  { %v601_v59 = vsel %vm181_vm1, %v598_v27, %v591_v16  ;;  %982 = vst [vmem:[%s1627_s6 + $0x20] sm:$0x3] %v689_v28  ;;  %1030 = vlog2.f32 %v636_v19  ;;  %v748_v32 = vrot.slane %v747_v4, 4  ;;  %v754_v7 = vsel %vm164_vm0, %v1442_v43, 0.0  ;;  %v1531_v43 = vld [vmem:[%s1628_s0 + $0x2] sm:$0x3] }
  0x6b   :  { %v603_v34 = vadd.f32 %v975_v26, %v601_v59  ;;  %v701_v45 = vadd.f32 %v700_v29, %v699_v22  ;;  %v708_v36 = vadd.f32 %v707_v30, %v706_v23  ;;  %v634_v37 = vmax.f32 %v632_v31, -100.0  ;;  %v987_v26 = vld [vmem:[%s1627_s6 + $0x26] sm:$0x3] }
  0x6c   :  { %v717_v39 = vmul.f32 %v1525_v38, %v633_v1  ;;  %v749_v40 = vadd.f32 %v748_v32, %v747_v4  ;;  %v755_v10 = vrot.slane %v754_v7, 4  ;;  %v784_v33 = vmul.f32 %v1531_v43, %v1520_v41 }
  0x6d   :  { %976 = vst [vmem:[%s1627_s6 + $0x1a] sm:$0x3] %v603_v34  ;;  %v702_v44 = vrot.slane %v701_v45, 1  ;;  %v709_v42 = vrot.slane %v708_v36, 1  ;;  %v718_v46 = vmul.f32 %v1531_v43, %v634_v37  ;;  %v787_v47 = vsel %vm164_vm0, %v783_v20, 0.0 }
  0x6e   :  { %v1029_v48 = vpop.eup %1028  ;;  %v750_v49 = vrot.slane %v749_v40, 2  ;;  %v756_v50 = vadd.f32 %v755_v10, %v754_v7  ;;  %v788_v51 = vrot.slane %v787_v47, 4  ;;  %v794_v52 = vsel %vm164_vm0, %v784_v33, 0.0 }
  0x6f   :  { %v703_v54 = vadd.f32 %v702_v44, %v701_v45  ;;  %v710_v55 = vadd.f32 %v709_v42, %v708_v36  ;;  %v638_v35 = vmul.f32 0.6931472, %v1029_v48  ;;  %v795_v0 = vrot.slane %v794_v52, 4 }
  0x70   :  { %v1031_v56 = vpop.eup %1030  ;;  %v751_v57 = vadd.f32 %v750_v49, %v749_v40  ;;  %v757_v2 = vrot.slane %v756_v50, 2  ;;  %v789_v58 = vadd.f32 %v788_v51, %v787_v47  ;;  %v807_v60 = vmul.f32 %v1493_v6, %v1493_v6 }
  0x71   :  { %v713_v61 = vsel %vm181_vm1, %v710_v55, %v703_v54  ;;  %v640_v62 = vmul.f32 0.6931472, %v1031_v56  ;;  %v641_v63 = vmax.f32 %v638_v35, -100.0  ;;  %v796_v3 = vadd.f32 %v795_v0, %v794_v52 }
  0x72   :  { %v715_v5 = vadd.f32 %v983_v53, %v713_v61  ;;  %v752_v9 = vrot.slane %v751_v57, 1  ;;  %v758_v11 = vadd.f32 %v757_v2, %v756_v50  ;;  %v790_v12 = vrot.slane %v789_v58, 2 }
  0x73   :  { %v642_v13 = vmax.f32 %v640_v62, -100.0  ;;  %v719_v14 = vmul.f32 %v641_v63, %v1200_v8  ;;  %v797_v15 = vrot.slane %v796_v3, 2  ;;  %v808_v16 = vmul.f32 %v1520_v41, %v1520_v41 }
  0x74   :  { %984 = vst [vmem:[%s1627_s6 + $0x22] sm:$0x3] %v715_v5  ;;  %v753_v18 = vadd.f32 %v752_v9, %v751_v57  ;;  %v759_v19 = vrot.slane %v758_v11, 1  ;;  %v791_v20 = vadd.f32 %v790_v12, %v789_v58  ;;  %v811_v21 = vsel %vm164_vm0, %v807_v60, 0.0 }
  0x75   :  { %v720_v22 = vmul.f32 %v642_v13, %v1215_v17  ;;  %v721_v23 = vadd.f32 %v719_v14, %v717_v39  ;;  %v798_v24 = vadd.f32 %v797_v15, %v796_v3  ;;  %v812_v25 = vrot.slane %v811_v21, 4  ;;  %v989_v39 = vld [vmem:[%s1627_s6 + $0x28] sm:$0x3] }
  0x76   :  { %v760_v27 = vadd.f32 %v759_v19, %v758_v11  ;;  %v792_v28 = vrot.slane %v791_v20, 1  ;;  %v818_v4 = vsel %vm164_vm0, %v808_v16, 0.0  ;;  %v831_v29 = vsub.f32 %v1493_v6, %v1525_v38 }
  0x77   :  { %v722_v30 = vadd.f32 %v720_v22, %v718_v46  ;;  %v725_v31 = vsel %vm164_vm0, %v721_v23, 0.0  ;;  %v799_v1 = vrot.slane %v798_v24, 1  ;;  %v813_v59 = vadd.f32 %v812_v25, %v811_v21 }
  0x78   :  { %v726_v32 = vrot.slane %v725_v31, 4  ;;  %v763_v7 = vsel %vm181_vm1, %v760_v27, %v753_v18  ;;  %v793_v34 = vadd.f32 %v792_v28, %v791_v20  ;;  %v819_v45 = vrot.slane %v818_v4, 4  ;;  %v991_v18 = vld [vmem:[%s1627_s6 + $0x2a] sm:$0x3] }
  0x79   :  { %v732_v36 = vsel %vm164_vm0, %v722_v30, 0.0  ;;  %v765_v37 = vadd.f32 %v987_v26, %v763_v7  ;;  %v800_v40 = vadd.f32 %v799_v1, %v798_v24  ;;  %v814_v10 = vrot.slane %v813_v59, 2 }
  0x7a   :  { %v727_v33 = vadd.f32 %v726_v32, %v725_v31  ;;  %v733_v44 = vrot.slane %v732_v36, 4  ;;  %v820_v42 = vadd.f32 %v819_v45, %v818_v4  ;;  %v832_v46 = vsub.f32 %v1520_v41, %v1531_v43 }
  0x7b   :  { %988 = vst [vmem:[%s1627_s6 + $0x26] sm:$0x3] %v765_v37  ;;  %v803_v47 = vsel %vm181_vm1, %v800_v40, %v793_v34  ;;  %v815_v48 = vadd.f32 %v814_v10, %v813_v59  ;;  %v833_v49 = vand.u32 2147483647, %v831_v29  ;;  %1032 = vlog2.f32 %v1493_v6 }
  0x7c   :  { %v728_v50 = vrot.slane %v727_v33, 2  ;;  %v734_v51 = vadd.f32 %v733_v44, %v732_v36  ;;  %v805_v52 = vadd.f32 %v989_v39, %v803_v47  ;;  %v821_v53 = vrot.slane %v820_v42, 2 }
  0x7d   :  { %v816_v54 = vrot.slane %v815_v48, 1  ;;  %v834_v55 = vand.u32 2147483647, %v832_v46  ;;  %v837_v35 = vsel %vm164_vm0, %v833_v49, 0.0  ;;  %1034 = vlog2.f32 %v1520_v41  ;;  %v993_v49 = vld [vmem:[%s1627_s6 + $0x2c] sm:$0x3] }
  0x7e   :  { %v729_v0 = vadd.f32 %v728_v50, %v727_v33  ;;  %v735_v56 = vrot.slane %v734_v51, 2  ;;  %990 = vst [vmem:[%s1627_s6 + $0x28] sm:$0x3] %v805_v52  ;;  %v822_v57 = vadd.f32 %v821_v53, %v820_v42  ;;  %v838_v2 = vrot.slane %v837_v35, 4 }
  0x7f   :  { %v817_v58 = vadd.f32 %v816_v54, %v815_v48  ;;  %v844_v60 = vsel %vm164_vm0, %v834_v55, 0.0  ;;  %v775_v61 = vsub.f32 1.0, %v1493_v6  ;;  %v776_v62 = vsub.f32 1.0, %v1520_v41 }
  0x80   :  { %v730_v63 = vrot.slane %v729_v0, 1  ;;  %v736_v3 = vadd.f32 %v735_v56, %v734_v51  ;;  %v823_v5 = vrot.slane %v822_v57, 1  ;;  %v839_v9 = vadd.f32 %v838_v2, %v837_v35 }
  0x81   :  { %v1033_v11 = vpop.eup %1032  ;;  %v845_v12 = vrot.slane %v844_v60, 4  ;;  %1036 = vlog2.f32 %v775_v61  ;;  %v887_v13 = vsel %vm164_vm0, %v1493_v6, 0.0  ;;  %v894_v14 = vsel %vm164_vm0, %v1520_v41, 0.0  ;;  %v985_v6 = vld [vmem:[%s1627_s6 + $0x24] sm:$0x3] }
  0x82   :  { %v731_v15 = vadd.f32 %v730_v63, %v729_v0  ;;  %v737_v16 = vrot.slane %v736_v3, 1  ;;  %v824_v19 = vadd.f32 %v823_v5, %v822_v57  ;;  %v840_v20 = vrot.slane %v839_v9, 2 }
  0x83   :  { %v1035_v21 = vpop.eup %1034  ;;  %v846_v22 = vadd.f32 %v845_v12, %v844_v60  ;;  %v770_v23 = vmul.f32 0.6931472, %v1033_v11  ;;  %1038 = vlog2.f32 %v776_v62  ;;  %v888_v24 = vrot.slane %v887_v13, 4 }
  0x84   :  { %v738_v25 = vadd.f32 %v737_v16, %v736_v3  ;;  %v827_v41 = vsel %vm181_vm1, %v824_v19, %v817_v58  ;;  %v841_v26 = vadd.f32 %v840_v20, %v839_v9  ;;  %v772_v27 = vmul.f32 0.6931472, %v1035_v21  ;;  %v995_v19 = vld [vmem:[%s1627_s6 + $0x2e] sm:$0x3] }
  0x85   :  { %v829_v28 = vadd.f32 %v991_v18, %v827_v41  ;;  %v847_v4 = vrot.slane %v846_v22, 2  ;;  %v889_v29 = vadd.f32 %v888_v24, %v887_v13  ;;  %v773_v1 = vmax.f32 %v770_v23, -100.0 }
  0x86   :  { %v741_v30 = vsel %vm181_vm1, %v738_v25, %v731_v15  ;;  %v842_v31 = vrot.slane %v841_v26, 1  ;;  %v895_v59 = vrot.slane %v894_v14, 4  ;;  %v774_v36 = vmax.f32 %v772_v27, -100.0 }
  0x87   :  { %v1037_v32 = vpop.eup %1036  ;;  %v743_v7 = vadd.f32 %v985_v6, %v741_v30  ;;  %992 = vst [vmem:[%s1627_s6 + $0x2a] sm:$0x3] %v829_v28  ;;  %v848_v34 = vadd.f32 %v847_v4, %v846_v22  ;;  %v890_v45 = vrot.slane %v889_v29, 2  ;;  %v857_v47 = vmul.f32 %v1525_v38, %v773_v1 }
  0x88   :  { %v778_v37 = vmul.f32 0.6931472, %v1037_v32  ;;  %v896_v39 = vadd.f32 %v895_v59, %v894_v14  ;;  %v843_v10 = vadd.f32 %v842_v31, %v841_v26  ;;  %v858_v53 = vmul.f32 %v1531_v43, %v774_v36 }
  0x89   :  { %v1039_v40 = vpop.eup %1038  ;;  %986 = vst [vmem:[%s1627_s6 + $0x24] sm:$0x3] %v743_v7  ;;  %v849_v33 = vrot.slane %v848_v34, 1  ;;  %v891_v44 = vadd.f32 %v890_v45, %v889_v29 }
  0x8a   :  { %v780_v42 = vmul.f32 0.6931472, %v1039_v40  ;;  %v781_v46 = vmax.f32 %v778_v37, -100.0  ;;  %v897_v48 = vrot.slane %v896_v39, 2 }
  0x8b   :  { %v850_v50 = vadd.f32 %v849_v33, %v848_v34  ;;  %v892_v51 = vrot.slane %v891_v44, 1 }
  0x8c   :  { %v782_v52 = vmax.f32 %v780_v42, -100.0  ;;  %v859_v54 = vmul.f32 %v781_v46, %v1200_v8  ;;  %v898_v55 = vadd.f32 %v897_v48, %v896_v39  ;;  %v997_v8 = vld [vmem:[%s1627_s6 + $0x30] sm:$0x3] }
  0x8d   :  { %v853_v35 = vsel %vm181_vm1, %v850_v50, %v843_v10  ;;  %v893_v0 = vadd.f32 %v892_v51, %v891_v44 }
  0x8e   :  { %v855_v56 = vadd.f32 %v993_v49, %v853_v35  ;;  %v860_v57 = vmul.f32 %v782_v52, %v1215_v17  ;;  %v861_v38 = vadd.f32 %v859_v54, %v857_v47  ;;  %v899_v2 = vrot.slane %v898_v55, 1 }
  0x90   :  { %994 = vst [vmem:[%s1627_s6 + $0x2c] sm:$0x3] %v855_v56  ;;  %v862_v58 = vadd.f32 %v860_v57, %v858_v53  ;;  %v865_v60 = vsel %vm164_vm0, %v861_v38, 0.0  ;;  %v900_v43 = vadd.f32 %v899_v2, %v898_v55 }
  0x91   :  { %v866_v61 = vrot.slane %v865_v60, 4 }
  0x92   :  { %v872_v62 = vsel %vm164_vm0, %v862_v58, 0.0  ;;  %v903_v63 = vsel %vm181_vm1, %v900_v43, %v893_v0 }
  0x93   :  { %v867_v17 = vadd.f32 %v866_v61, %v865_v60  ;;  %v873_v3 = vrot.slane %v872_v62, 4  ;;  %v905_v5 = vadd.f32 %v997_v8, %v903_v63 }
  0x95   :  { %v868_v9 = vrot.slane %v867_v17, 2  ;;  %v874_v11 = vadd.f32 %v873_v3, %v872_v62  ;;  %998 = vst [vmem:[%s1627_s6 + $0x30] sm:$0x3] %v905_v5 }
  0x97   :  { %v869_v12 = vadd.f32 %v868_v9, %v867_v17  ;;  %v875_v13 = vrot.slane %v874_v11, 2 }
  0x99   :  { %v870_v14 = vrot.slane %v869_v12, 1  ;;  %v876_v15 = vadd.f32 %v875_v13, %v874_v11 }
  0x9b   :  { %v871_v16 = vadd.f32 %v870_v14, %v869_v12  ;;  %v877_v18 = vrot.slane %v876_v15, 1 }
  0x9d   :  { %v878_v20 = vadd.f32 %v877_v18, %v876_v15 }
  0x9f   :  { %v881_v21 = vsel %vm181_vm1, %v878_v20, %v871_v16 }
  0xa0   :  { %v883_v22 = vadd.f32 %v995_v19, %v881_v21 }
  0xa2   :  { %996 = vst [vmem:[%s1627_s6 + $0x2e] sm:$0x3] %v883_v22 }

</bundles_post_ra>
